<compile_context>
chip_gen: v5e
topology: v5e:2x2
jax: 0.10.0
libtpu: 0.0.40
codegen_flags: <defaults>
</compile_context>

<pallas_src>
import jax
import jax.numpy as jnp
from jax.experimental import pallas as pl
from jax.experimental.pallas import tpu as pltpu

# ---- small synthetic config (GFR2Config fields used by the module) ----------
HIDDEN = 64
NUM_HEADS = 4
NUM_KV_HEADS = 4          # num_key_value_groups == 1
QK_ROPE = 16              # qk_rope_head_dim
QK_HEAD = 32              # qk_head_dim (dim_scale = 1, concat_input=False)
QK_NOPE = QK_HEAD - QK_ROPE
Q_LORA = 32               # q_lora_rank
KV_LORA = 32              # kv_lora_rank
V_HEAD = 32               # v_head_dim
ROPE_THETA = 10000.0
EPS = 1e-6
SCALING = float(QK_HEAD) ** -0.5   # (qk_head_dim / dim_scale) ** -0.5, no yarn mscale

_DN_LAST = (((1,), (1,)), ((), ()))   # dot_general: contract last dims, no batch


def _rms(x, w):
    # GFR2RMSNorm: fp32 mean-square, rsqrt, scale by weight.
    var = jnp.mean(x * x, axis=-1, keepdims=True)
    return (x * jax.lax.rsqrt(var + EPS)) * w


# --------------------------- fused forward kernel ------------------------------
def _fused_mla_kernel(x_ref, w_qa_ref, qa_ln_ref,
                      w_qnope_ref, w_qrope_ref, w_qrope_rot_ref,
                      w_ckv_ref, w_krot_ref, w_krot_rot_ref, kv_ln_ref,
                      w_knope_ref, w_v_ref, w_o_ref,
                      cos_q_ref, sin_q_ref, cos_k_ref, sin_k_ref,
                      o_ref):
    f32 = jnp.float32
    x = x_ref[0].astype(f32)                                  # (S, HIDDEN)
    s_len = x.shape[0]

    # ---- q path: q_a_proj -> RMSNorm -> q_b_proj (nope / rope, all heads) ----
    # Attention scaling is pre-folded into w_qnope / w_qrope / w_qrope_rot.
    q_a = jnp.dot(x, w_qa_ref[...], preferred_element_type=f32)
    q_a = _rms(q_a, qa_ln_ref[...])                           # (S, Q_LORA)
    q_pass = jnp.dot(q_a, w_qnope_ref[...], preferred_element_type=f32)     # (S, H*NOPE)
    q_rot = jnp.dot(q_a, w_qrope_ref[...], preferred_element_type=f32)      # (S, H*ROPE)
    q_rot_half = jnp.dot(q_a, w_qrope_rot_ref[...], preferred_element_type=f32)
    q_rot = q_rot * cos_q_ref[0] + q_rot_half * sin_q_ref[0]  # rope, all heads at once

    # ---- kv path: kv_a_proj (split) -> RMSNorm -> kv_b_proj ----
    ckv = jnp.dot(x, w_ckv_ref[...], preferred_element_type=f32)            # (S, KV_LORA)
    k_rot = jnp.dot(x, w_krot_ref[...], preferred_element_type=f32)         # (S, ROPE)
    k_rot_half = jnp.dot(x, w_krot_rot_ref[...], preferred_element_type=f32)
    k_rot = k_rot * cos_k_ref[0] + k_rot_half * sin_k_ref[0]  # shared across heads (MQA)
    ckv = _rms(ckv, kv_ln_ref[...])
    k_pass = jnp.dot(ckv, w_knope_ref[...], preferred_element_type=f32)     # (S, H*NOPE)
    v_all = jnp.dot(ckv, w_v_ref[...], preferred_element_type=f32)          # (S, H*V)

    # ---- attention (causal, fp32 softmax) ----
    row = jax.lax.broadcasted_iota(jnp.int32, (s_len, s_len), 0)
    col = jax.lax.broadcasted_iota(jnp.int32, (s_len, s_len), 1)
    causal = col <= row
    neg_inf = jnp.float32(jnp.finfo(jnp.float32).min)

    head_outs = []
    for h in range(NUM_HEADS):                                # unrolled (H = 4)
        qp = q_pass[:, h * QK_NOPE:(h + 1) * QK_NOPE]
        qr = q_rot[:, h * QK_ROPE:(h + 1) * QK_ROPE]
        kp = k_pass[:, h * QK_NOPE:(h + 1) * QK_NOPE]
        vh = v_all[:, h * V_HEAD:(h + 1) * V_HEAD]

        s = (jax.lax.dot_general(qp, kp, _DN_LAST, preferred_element_type=f32)
             + jax.lax.dot_general(qr, k_rot, _DN_LAST, preferred_element_type=f32))
        s = jnp.where(causal, s, neg_inf)
        m = jnp.max(s, axis=-1, keepdims=True)
        e = jnp.exp(s - m)
        l = jnp.sum(e, axis=-1, keepdims=True)
        p = e * pl.reciprocal(l, approx=True)                 # EUP divide (free slot)

        head_outs.append(jnp.dot(p, vh, preferred_element_type=f32))   # (S, V_HEAD)

    # One lane-dense o_proj: (S, H*V) @ (H*V, HIDDEN)  -- single 128-deep matmul
    attn_out = jnp.concatenate(head_outs, axis=-1)            # (S, H*V_HEAD)
    o_ref[0] = jnp.dot(attn_out, w_o_ref[...],
                       preferred_element_type=f32).astype(o_ref.dtype)


def _rotate_half_rows(w, axis):
    # Absorb rotate_half into the projection weight along the output-dim axis.
    half = w.shape[axis] // 2
    lo = jax.lax.slice_in_dim(w, 0, half, axis=axis)
    hi = jax.lax.slice_in_dim(w, half, 2 * half, axis=axis)
    return jnp.concatenate([-hi, lo], axis=axis)


def gfr2_mla_forward(hidden_states, params, cos, sin):
    B, S, Dh = hidden_states.shape
    H = NUM_HEADS

    # ---- wrapper-side weight re-layout (tiny, once per call; keeps the kernel
    #      free of transposes / lane re-shuffles) --------------------------------
    w_qa = params["q_a_proj"].T                                   # (HIDDEN, Q_LORA)
    qa_ln = params["q_a_layernorm"].reshape(1, -1)

    qb = params["q_b_proj"].reshape(H, QK_HEAD, Q_LORA)
    # Attention scaling folded into the q-side projections (exact).
    w_qnope = (qb[:, :QK_NOPE, :].transpose(2, 0, 1)
               .reshape(Q_LORA, H * QK_NOPE)) * SCALING
    qr = qb[:, QK_NOPE:, :]
    w_qrope = (qr.transpose(2, 0, 1).reshape(Q_LORA, H * QK_ROPE)) * SCALING
    w_qrope_rot = (_rotate_half_rows(qr, axis=1).transpose(2, 0, 1)
                   .reshape(Q_LORA, H * QK_ROPE)) * SCALING

    kva = params["kv_a_proj_with_mqa"]
    w_ckv = kva[:KV_LORA, :].T                                    # (HIDDEN, KV_LORA)
    kr = kva[KV_LORA:, :]
    w_krot = kr.T                                                 # (HIDDEN, ROPE)
    w_krot_rot = _rotate_half_rows(kr, axis=0).T
    kv_ln = params["kv_a_layernorm"].reshape(1, -1)

    kvb = params["kv_b_proj"].reshape(H, QK_NOPE + V_HEAD, KV_LORA)
    w_knope = kvb[:, :QK_NOPE, :].transpose(2, 0, 1).reshape(KV_LORA, H * QK_NOPE)
    w_v = kvb[:, QK_NOPE:, :].transpose(2, 0, 1).reshape(KV_LORA, H * V_HEAD)
    w_o = params["o_proj"].T                                      # (H*V_HEAD, HIDDEN)

    cos_q = jnp.tile(cos, (1, 1, H))                              # (B, S, H*ROPE)
    sin_q = jnp.tile(sin, (1, 1, H))

    def full(arr):
        shape = arr.shape
        return pl.BlockSpec(shape, lambda b, _s=shape: (0,) * len(_s))

    def per_batch(d):
        return pl.BlockSpec((1, S, d), lambda b: (b, 0, 0))

    return pl.pallas_call(
        _fused_mla_kernel,
        out_shape=jax.ShapeDtypeStruct((B, S, Dh), hidden_states.dtype),
        grid=(B,),
        in_specs=[
            per_batch(Dh),
            full(w_qa), full(qa_ln),
            full(w_qnope), full(w_qrope), full(w_qrope_rot),
            full(w_ckv), full(w_krot), full(w_krot_rot), full(kv_ln),
            full(w_knope), full(w_v), full(w_o),
            per_batch(H * QK_ROPE), per_batch(H * QK_ROPE),
            per_batch(QK_ROPE), per_batch(QK_ROPE),
        ],
        out_specs=per_batch(Dh),
        compiler_params=pltpu.CompilerParams(
            dimension_semantics=("parallel",)),
    )(hidden_states, w_qa, qa_ln, w_qnope, w_qrope, w_qrope_rot,
      w_ckv, w_krot, w_krot_rot, kv_ln, w_knope, w_v, w_o,
      cos_q, sin_q, cos, sin)


# ----------------------- pure-JAX reference (sanity check) ---------------------
def _rms_ref(x, w):
    xf = x.astype(jnp.float32)
    var = jnp.mean(xf * xf, axis=-1, keepdims=True)
    return w * (xf * jax.lax.rsqrt(var + EPS)).astype(x.dtype)


def _rotate_half_ref(t):
    half = t.shape[-1] // 2
    return jnp.concatenate([-t[..., half:], t[..., :half]], axis=-1)


def reference_forward(hidden_states, params, cos, sin):
    B, S, Dh = hidden_states.shape
    x = hidden_states
    q_a = _rms_ref(x @ params["q_a_proj"].T, params["q_a_layernorm"])
    q = (q_a @ params["q_b_proj"].T).reshape(B, S, NUM_HEADS, QK_HEAD).transpose(0, 2, 1, 3)
    q_pass, q_rot = q[..., :QK_NOPE], q[..., QK_NOPE:]
    ckv = x @ params["kv_a_proj_with_mqa"].T
    k_c, k_rot = ckv[..., :KV_LORA], ckv[..., KV_LORA:]
    kv = (_rms_ref(k_c, params["kv_a_layernorm"]) @ params["kv_b_proj"].T)
    kv = kv.reshape(B, S, NUM_HEADS, QK_NOPE + V_HEAD).transpose(0, 2, 1, 3)
    k_pass, v = kv[..., :QK_NOPE], kv[..., QK_NOPE:]
    k_rot = k_rot.reshape(B, 1, S, QK_ROPE)
    cos_, sin_ = cos[:, None], sin[:, None]
    q_rot = q_rot * cos_ + _rotate_half_ref(q_rot) * sin_
    k_rot = k_rot * cos_ + _rotate_half_ref(k_rot) * sin_
    k_rot = jnp.broadcast_to(k_rot, k_pass.shape[:-1] + (QK_ROPE,))
    qs = jnp.concatenate([q_pass, q_rot], axis=-1)
    ks = jnp.concatenate([k_pass, k_rot], axis=-1)
    s = jnp.einsum("bhqd,bhkd->bhqk", qs, ks) * SCALING
    mask = jnp.tril(jnp.ones((S, S), bool))
    s = jnp.where(mask, s, jnp.finfo(jnp.float32).min)
    p = jax.nn.softmax(s.astype(jnp.float32), axis=-1)
    o = jnp.einsum("bhqk,bhkd->bhqd", p, v)
    o = o.transpose(0, 2, 1, 3).reshape(B, S, NUM_HEADS * V_HEAD)
    return o @ params["o_proj"].T


# ------------------------------- main ------------------------------------------
if __name__ == "__main__":
    B, S = 2, 8
    key = jax.random.PRNGKey(0)
    keys = jax.random.split(key, 8)

    def init(k, shape, scale=0.02):
        return scale * jax.random.normal(k, shape, dtype=jnp.float32)

    # nn.Linear weight layout: (out_features, in_features); attention_bias=False
    params = {
        "q_a_proj": init(keys[0], (Q_LORA, HIDDEN)),
        "q_a_layernorm": jnp.ones((Q_LORA,), jnp.float32),
        "q_b_proj": init(keys[1], (NUM_HEADS * QK_HEAD, Q_LORA)),
        "kv_a_proj_with_mqa": init(keys[2], (KV_LORA + QK_ROPE, HIDDEN)),
        "kv_a_layernorm": jnp.ones((KV_LORA,), jnp.float32),
        "kv_b_proj": init(keys[3], (NUM_HEADS * (QK_NOPE + V_HEAD), KV_LORA)),
        "o_proj": init(keys[4], (HIDDEN, NUM_HEADS * V_HEAD)),
    }

    hidden_states = jax.random.normal(keys[5], (B, S, HIDDEN), dtype=jnp.float32)

    # rotary position embeddings (cos, sin) with dim = qk_rope_head_dim
    pos = jnp.arange(S, dtype=jnp.float32)
    inv_freq = 1.0 / (
        ROPE_THETA ** (jnp.arange(0, QK_ROPE, 2, dtype=jnp.float32) / QK_ROPE)
    )
    freqs = pos[:, None] * inv_freq[None, :]
    emb = jnp.concatenate((freqs, freqs), axis=-1)            # (S, QK_ROPE)
    cos = jnp.broadcast_to(jnp.cos(emb)[None], (B, S, QK_ROPE))
    sin = jnp.broadcast_to(jnp.sin(emb)[None], (B, S, QK_ROPE))

    out = jax.jit(gfr2_mla_forward)(hidden_states, params, cos, sin)
    jax.block_until_ready(out)
    assert out.shape == (B, S, HIDDEN)

    with jax.default_matmul_precision("highest"):
        ref = reference_forward(hidden_states, params, cos, sin)
    assert jnp.allclose(out, ref, rtol=5e-2, atol=2e-3), (
        float(jnp.max(jnp.abs(out - ref))))

    print("KERNEL_OK")
</pallas_src>

<mosaic_0001>
module attributes {stable_mosaic.version = 11 : i64} {
  func.func @_fused_mla_kernel(%arg0: i32, %arg1: memref<1x8x64xf32, #tpu.memory_space<vmem>>, %arg2: memref<64x32xf32, #tpu.memory_space<vmem>>, %arg3: memref<1x32xf32, #tpu.memory_space<vmem>>, %arg4: memref<32x64xf32, #tpu.memory_space<vmem>>, %arg5: memref<32x64xf32, #tpu.memory_space<vmem>>, %arg6: memref<32x64xf32, #tpu.memory_space<vmem>>, %arg7: memref<64x32xf32, #tpu.memory_space<vmem>>, %arg8: memref<64x16xf32, #tpu.memory_space<vmem>>, %arg9: memref<64x16xf32, #tpu.memory_space<vmem>>, %arg10: memref<1x32xf32, #tpu.memory_space<vmem>>, %arg11: memref<32x64xf32, #tpu.memory_space<vmem>>, %arg12: memref<32x128xf32, #tpu.memory_space<vmem>>, %arg13: memref<128x64xf32, #tpu.memory_space<vmem>>, %arg14: memref<1x8x64xf32, #tpu.memory_space<vmem>>, %arg15: memref<1x8x64xf32, #tpu.memory_space<vmem>>, %arg16: memref<1x8x16xf32, #tpu.memory_space<vmem>>, %arg17: memref<1x8x16xf32, #tpu.memory_space<vmem>>, %arg18: memref<1x8x64xf32, #tpu.memory_space<vmem>>) attributes {dimension_semantics = [#tpu.dimension_semantics<parallel>], iteration_bounds = array<i64: 2>, scalar_prefetch = 0 : i64, scratch_operands = 0 : i64, tpu.core_type = #tpu.core_type<tc>, window_params = [{transform_indices = @transform_0, window_bounds = array<i64: 1, 8, 64>}, {pipeline_mode = #tpu.pipeline_mode<synchronous>, transform_indices = @transform_1, window_bounds = array<i64: 64, 32>}, {pipeline_mode = #tpu.pipeline_mode<synchronous>, transform_indices = @transform_2, window_bounds = array<i64: 1, 32>}, {pipeline_mode = #tpu.pipeline_mode<synchronous>, transform_indices = @transform_3, window_bounds = array<i64: 32, 64>}, {pipeline_mode = #tpu.pipeline_mode<synchronous>, transform_indices = @transform_4, window_bounds = array<i64: 32, 64>}, {pipeline_mode = #tpu.pipeline_mode<synchronous>, transform_indices = @transform_5, window_bounds = array<i64: 32, 64>}, {pipeline_mode = #tpu.pipeline_mode<synchronous>, transform_indices = @transform_6, window_bounds = array<i64: 64, 32>}, {pipeline_mode = #tpu.pipeline_mode<synchronous>, transform_indices = @transform_7, window_bounds = array<i64: 64, 16>}, {pipeline_mode = #tpu.pipeline_mode<synchronous>, transform_indices = @transform_8, window_bounds = array<i64: 64, 16>}, {pipeline_mode = #tpu.pipeline_mode<synchronous>, transform_indices = @transform_9, window_bounds = array<i64: 1, 32>}, {pipeline_mode = #tpu.pipeline_mode<synchronous>, transform_indices = @transform_10, window_bounds = array<i64: 32, 64>}, {pipeline_mode = #tpu.pipeline_mode<synchronous>, transform_indices = @transform_11, window_bounds = array<i64: 32, 128>}, {pipeline_mode = #tpu.pipeline_mode<synchronous>, transform_indices = @transform_12, window_bounds = array<i64: 128, 64>}, {transform_indices = @transform_13, window_bounds = array<i64: 1, 8, 64>}, {transform_indices = @transform_14, window_bounds = array<i64: 1, 8, 64>}, {transform_indices = @transform_15, window_bounds = array<i64: 1, 8, 16>}, {transform_indices = @transform_16, window_bounds = array<i64: 1, 8, 16>}, {transform_indices = @transform_17, window_bounds = array<i64: 1, 8, 64>}]} {
    %c0 = arith.constant 0 : index
    %c0_0 = arith.constant 0 : index
    %c0_1 = arith.constant 0 : index
    %0 = vector.load %arg1[%c0, %c0_0, %c0_1] : memref<1x8x64xf32, #tpu.memory_space<vmem>>, vector<1x8x64xf32>
    %1 = vector.shape_cast %0 : vector<1x8x64xf32> to vector<8x64xf32>
    %c0_2 = arith.constant 0 : index
    %c0_3 = arith.constant 0 : index
    %2 = vector.load %arg2[%c0_2, %c0_3] : memref<64x32xf32, #tpu.memory_space<vmem>>, vector<64x32xf32>
    %cst = arith.constant dense<0.000000e+00> : vector<8x32xf32>
    %3 = tpu.matmul %1, %2, %cst {dimension_numbers = #tpu.dot_dimension_numbers<[1], [0], [0], [1], [0, 0, 1, 1], [], []>} : vector<8x64xf32>, vector<64x32xf32>, vector<8x32xf32> -> vector<8x32xf32>
    %c0_4 = arith.constant 0 : index
    %c0_5 = arith.constant 0 : index
    %4 = vector.load %arg3[%c0_4, %c0_5] : memref<1x32xf32, #tpu.memory_space<vmem>>, vector<1x32xf32>
    %5 = arith.mulf %3, %3 : vector<8x32xf32>
    %cst_6 = arith.constant dense<0.000000e+00> : vector<8xf32>
    %6 = vector.multi_reduction <add>, %5, %cst_6 [1] : vector<8x32xf32> to vector<8xf32>
    %7 = vector.shape_cast %6 : vector<8xf32> to vector<8x1xf32>
    %cst_7 = arith.constant 3.200000e+01 : f32
    %8 = vector.broadcast %cst_7 : f32 to vector<8x1xf32>
    %9 = arith.divf %7, %8 : vector<8x1xf32>
    %cst_8 = arith.constant 9.99999997E-7 : f32
    %10 = vector.broadcast %cst_8 : f32 to vector<8x1xf32>
    %11 = arith.addf %9, %10 : vector<8x1xf32>
    %12 = math.rsqrt %11 : vector<8x1xf32>
    %13 = vector.broadcast %12 : vector<8x1xf32> to vector<8x32xf32>
    %14 = arith.mulf %3, %13 : vector<8x32xf32>
    %15 = vector.broadcast %4 : vector<1x32xf32> to vector<8x32xf32>
    %16 = arith.mulf %14, %15 : vector<8x32xf32>
    %c0_9 = arith.constant 0 : index
    %c0_10 = arith.constant 0 : index
    %17 = vector.load %arg4[%c0_9, %c0_10] : memref<32x64xf32, #tpu.memory_space<vmem>>, vector<32x64xf32>
    %cst_11 = arith.constant dense<0.000000e+00> : vector<8x64xf32>
    %18 = tpu.matmul %16, %17, %cst_11 {dimension_numbers = #tpu.dot_dimension_numbers<[1], [0], [0], [1], [0, 0, 1, 1], [], []>} : vector<8x32xf32>, vector<32x64xf32>, vector<8x64xf32> -> vector<8x64xf32>
    %c0_12 = arith.constant 0 : index
    %c0_13 = arith.constant 0 : index
    %19 = vector.load %arg5[%c0_12, %c0_13] : memref<32x64xf32, #tpu.memory_space<vmem>>, vector<32x64xf32>
    %cst_14 = arith.constant dense<0.000000e+00> : vector<8x64xf32>
    %20 = tpu.matmul %16, %19, %cst_14 {dimension_numbers = #tpu.dot_dimension_numbers<[1], [0], [0], [1], [0, 0, 1, 1], [], []>} : vector<8x32xf32>, vector<32x64xf32>, vector<8x64xf32> -> vector<8x64xf32>
    %c0_15 = arith.constant 0 : index
    %c0_16 = arith.constant 0 : index
    %21 = vector.load %arg6[%c0_15, %c0_16] : memref<32x64xf32, #tpu.memory_space<vmem>>, vector<32x64xf32>
    %cst_17 = arith.constant dense<0.000000e+00> : vector<8x64xf32>
    %22 = tpu.matmul %16, %21, %cst_17 {dimension_numbers = #tpu.dot_dimension_numbers<[1], [0], [0], [1], [0, 0, 1, 1], [], []>} : vector<8x32xf32>, vector<32x64xf32>, vector<8x64xf32> -> vector<8x64xf32>
    %c0_18 = arith.constant 0 : index
    %c0_19 = arith.constant 0 : index
    %c0_20 = arith.constant 0 : index
    %23 = vector.load %arg14[%c0_18, %c0_19, %c0_20] : memref<1x8x64xf32, #tpu.memory_space<vmem>>, vector<1x8x64xf32>
    %24 = vector.shape_cast %23 : vector<1x8x64xf32> to vector<8x64xf32>
    %25 = arith.mulf %20, %24 : vector<8x64xf32>
    %c0_21 = arith.constant 0 : index
    %c0_22 = arith.constant 0 : index
    %c0_23 = arith.constant 0 : index
    %26 = vector.load %arg15[%c0_21, %c0_22, %c0_23] : memref<1x8x64xf32, #tpu.memory_space<vmem>>, vector<1x8x64xf32>
    %27 = vector.shape_cast %26 : vector<1x8x64xf32> to vector<8x64xf32>
    %28 = arith.mulf %22, %27 : vector<8x64xf32>
    %29 = arith.addf %25, %28 : vector<8x64xf32>
    %c0_24 = arith.constant 0 : index
    %c0_25 = arith.constant 0 : index
    %30 = vector.load %arg7[%c0_24, %c0_25] : memref<64x32xf32, #tpu.memory_space<vmem>>, vector<64x32xf32>
    %cst_26 = arith.constant dense<0.000000e+00> : vector<8x32xf32>
    %31 = tpu.matmul %1, %30, %cst_26 {dimension_numbers = #tpu.dot_dimension_numbers<[1], [0], [0], [1], [0, 0, 1, 1], [], []>} : vector<8x64xf32>, vector<64x32xf32>, vector<8x32xf32> -> vector<8x32xf32>
    %c0_27 = arith.constant 0 : index
    %c0_28 = arith.constant 0 : index
    %32 = vector.load %arg8[%c0_27, %c0_28] : memref<64x16xf32, #tpu.memory_space<vmem>>, vector<64x16xf32>
    %cst_29 = arith.constant dense<0.000000e+00> : vector<8x16xf32>
    %33 = tpu.matmul %1, %32, %cst_29 {dimension_numbers = #tpu.dot_dimension_numbers<[1], [0], [0], [1], [0, 0, 1, 1], [], []>} : vector<8x64xf32>, vector<64x16xf32>, vector<8x16xf32> -> vector<8x16xf32>
    %c0_30 = arith.constant 0 : index
    %c0_31 = arith.constant 0 : index
    %34 = vector.load %arg9[%c0_30, %c0_31] : memref<64x16xf32, #tpu.memory_space<vmem>>, vector<64x16xf32>
    %cst_32 = arith.constant dense<0.000000e+00> : vector<8x16xf32>
    %35 = tpu.matmul %1, %34, %cst_32 {dimension_numbers = #tpu.dot_dimension_numbers<[1], [0], [0], [1], [0, 0, 1, 1], [], []>} : vector<8x64xf32>, vector<64x16xf32>, vector<8x16xf32> -> vector<8x16xf32>
    %c0_33 = arith.constant 0 : index
    %c0_34 = arith.constant 0 : index
    %c0_35 = arith.constant 0 : index
    %36 = vector.load %arg16[%c0_33, %c0_34, %c0_35] : memref<1x8x16xf32, #tpu.memory_space<vmem>>, vector<1x8x16xf32>
    %37 = vector.shape_cast %36 : vector<1x8x16xf32> to vector<8x16xf32>
    %38 = arith.mulf %33, %37 : vector<8x16xf32>
    %c0_36 = arith.constant 0 : index
    %c0_37 = arith.constant 0 : index
    %c0_38 = arith.constant 0 : index
    %39 = vector.load %arg17[%c0_36, %c0_37, %c0_38] : memref<1x8x16xf32, #tpu.memory_space<vmem>>, vector<1x8x16xf32>
    %40 = vector.shape_cast %39 : vector<1x8x16xf32> to vector<8x16xf32>
    %41 = arith.mulf %35, %40 : vector<8x16xf32>
    %42 = arith.addf %38, %41 : vector<8x16xf32>
    %c0_39 = arith.constant 0 : index
    %c0_40 = arith.constant 0 : index
    %43 = vector.load %arg10[%c0_39, %c0_40] : memref<1x32xf32, #tpu.memory_space<vmem>>, vector<1x32xf32>
    %44 = arith.mulf %31, %31 : vector<8x32xf32>
    %cst_41 = arith.constant dense<0.000000e+00> : vector<8xf32>
    %45 = vector.multi_reduction <add>, %44, %cst_41 [1] : vector<8x32xf32> to vector<8xf32>
    %46 = vector.shape_cast %45 : vector<8xf32> to vector<8x1xf32>
    %cst_42 = arith.constant 3.200000e+01 : f32
    %47 = vector.broadcast %cst_42 : f32 to vector<8x1xf32>
    %48 = arith.divf %46, %47 : vector<8x1xf32>
    %cst_43 = arith.constant 9.99999997E-7 : f32
    %49 = vector.broadcast %cst_43 : f32 to vector<8x1xf32>
    %50 = arith.addf %48, %49 : vector<8x1xf32>
    %51 = math.rsqrt %50 : vector<8x1xf32>
    %52 = vector.broadcast %51 : vector<8x1xf32> to vector<8x32xf32>
    %53 = arith.mulf %31, %52 : vector<8x32xf32>
    %54 = vector.broadcast %43 : vector<1x32xf32> to vector<8x32xf32>
    %55 = arith.mulf %53, %54 : vector<8x32xf32>
    %c0_44 = arith.constant 0 : index
    %c0_45 = arith.constant 0 : index
    %56 = vector.load %arg11[%c0_44, %c0_45] : memref<32x64xf32, #tpu.memory_space<vmem>>, vector<32x64xf32>
    %cst_46 = arith.constant dense<0.000000e+00> : vector<8x64xf32>
    %57 = tpu.matmul %55, %56, %cst_46 {dimension_numbers = #tpu.dot_dimension_numbers<[1], [0], [0], [1], [0, 0, 1, 1], [], []>} : vector<8x32xf32>, vector<32x64xf32>, vector<8x64xf32> -> vector<8x64xf32>
    %c0_47 = arith.constant 0 : index
    %c0_48 = arith.constant 0 : index
    %58 = vector.load %arg12[%c0_47, %c0_48] : memref<32x128xf32, #tpu.memory_space<vmem>>, vector<32x128xf32>
    %cst_49 = arith.constant dense<0.000000e+00> : vector<8x128xf32>
    %59 = tpu.matmul %55, %58, %cst_49 {dimension_numbers = #tpu.dot_dimension_numbers<[1], [0], [0], [1], [0, 0, 1, 1], [], []>} : vector<8x32xf32>, vector<32x128xf32>, vector<8x128xf32> -> vector<8x128xf32>
    %60 = tpu.iota {dimensions = array<i32: 0>} : vector<8x8xi32>
    %61 = tpu.iota {dimensions = array<i32: 1>} : vector<8x8xi32>
    %62 = arith.cmpi sle, %61, %60 : vector<8x8xi32>
    %63 = vector.extract_strided_slice %18 {offsets = [0, 0], sizes = [8, 16], strides = [1, 1]} : vector<8x64xf32> to vector<8x16xf32>
    %64 = vector.extract_strided_slice %29 {offsets = [0, 0], sizes = [8, 16], strides = [1, 1]} : vector<8x64xf32> to vector<8x16xf32>
    %65 = vector.extract_strided_slice %57 {offsets = [0, 0], sizes = [8, 16], strides = [1, 1]} : vector<8x64xf32> to vector<8x16xf32>
    %66 = vector.extract_strided_slice %59 {offsets = [0, 0], sizes = [8, 32], strides = [1, 1]} : vector<8x128xf32> to vector<8x32xf32>
    %cst_50 = arith.constant dense<0.000000e+00> : vector<8x8xf32>
    %67 = tpu.matmul %63, %65, %cst_50 {dimension_numbers = #tpu.dot_dimension_numbers<[1], [1], [0], [0], [0, 0, 1, 0], [], []>} : vector<8x16xf32>, vector<8x16xf32>, vector<8x8xf32> -> vector<8x8xf32>
    %cst_51 = arith.constant dense<0.000000e+00> : vector<8x8xf32>
    %68 = tpu.matmul %64, %42, %cst_51 {dimension_numbers = #tpu.dot_dimension_numbers<[1], [1], [0], [0], [0, 0, 1, 0], [], []>} : vector<8x16xf32>, vector<8x16xf32>, vector<8x8xf32> -> vector<8x8xf32>
    %69 = arith.addf %67, %68 : vector<8x8xf32>
    %cst_52 = arith.constant -3.40282347E+38 : f32
    %70 = vector.broadcast %cst_52 : f32 to vector<8x8xf32>
    %71 = arith.select %62, %69, %70 : vector<8x8xi1>, vector<8x8xf32>
    %cst_53 = arith.constant dense<0xFF800000> : vector<8xf32>
    %72 = vector.multi_reduction <maximumf>, %71, %cst_53 [1] : vector<8x8xf32> to vector<8xf32>
    %73 = vector.shape_cast %72 : vector<8xf32> to vector<8x1xf32>
    %74 = vector.broadcast %73 : vector<8x1xf32> to vector<8x8xf32>
    %75 = arith.subf %71, %74 : vector<8x8xf32>
    %76 = math.exp %75 : vector<8x8xf32>
    %cst_54 = arith.constant dense<0.000000e+00> : vector<8xf32>
    %77 = vector.multi_reduction <add>, %76, %cst_54 [1] : vector<8x8xf32> to vector<8xf32>
    %78 = vector.shape_cast %77 : vector<8xf32> to vector<8x1xf32>
    %79 = tpu.reciprocal %78 {approx = true} : vector<8x1xf32> -> vector<8x1xf32>
    %80 = vector.broadcast %79 : vector<8x1xf32> to vector<8x8xf32>
    %81 = arith.mulf %76, %80 : vector<8x8xf32>
    %cst_55 = arith.constant dense<0.000000e+00> : vector<8x32xf32>
    %82 = tpu.matmul %81, %66, %cst_55 {dimension_numbers = #tpu.dot_dimension_numbers<[1], [0], [0], [1], [0, 0, 1, 1], [], []>} : vector<8x8xf32>, vector<8x32xf32>, vector<8x32xf32> -> vector<8x32xf32>
    %83 = vector.extract_strided_slice %18 {offsets = [0, 16], sizes = [8, 16], strides = [1, 1]} : vector<8x64xf32> to vector<8x16xf32>
    %84 = vector.extract_strided_slice %29 {offsets = [0, 16], sizes = [8, 16], strides = [1, 1]} : vector<8x64xf32> to vector<8x16xf32>
    %85 = vector.extract_strided_slice %57 {offsets = [0, 16], sizes = [8, 16], strides = [1, 1]} : vector<8x64xf32> to vector<8x16xf32>
    %86 = vector.extract_strided_slice %59 {offsets = [0, 32], sizes = [8, 32], strides = [1, 1]} : vector<8x128xf32> to vector<8x32xf32>
    %cst_56 = arith.constant dense<0.000000e+00> : vector<8x8xf32>
    %87 = tpu.matmul %83, %85, %cst_56 {dimension_numbers = #tpu.dot_dimension_numbers<[1], [1], [0], [0], [0, 0, 1, 0], [], []>} : vector<8x16xf32>, vector<8x16xf32>, vector<8x8xf32> -> vector<8x8xf32>
    %cst_57 = arith.constant dense<0.000000e+00> : vector<8x8xf32>
    %88 = tpu.matmul %84, %42, %cst_57 {dimension_numbers = #tpu.dot_dimension_numbers<[1], [1], [0], [0], [0, 0, 1, 0], [], []>} : vector<8x16xf32>, vector<8x16xf32>, vector<8x8xf32> -> vector<8x8xf32>
    %89 = arith.addf %87, %88 : vector<8x8xf32>
    %cst_58 = arith.constant -3.40282347E+38 : f32
    %90 = vector.broadcast %cst_58 : f32 to vector<8x8xf32>
    %91 = arith.select %62, %89, %90 : vector<8x8xi1>, vector<8x8xf32>
    %cst_59 = arith.constant dense<0xFF800000> : vector<8xf32>
    %92 = vector.multi_reduction <maximumf>, %91, %cst_59 [1] : vector<8x8xf32> to vector<8xf32>
    %93 = vector.shape_cast %92 : vector<8xf32> to vector<8x1xf32>
    %94 = vector.broadcast %93 : vector<8x1xf32> to vector<8x8xf32>
    %95 = arith.subf %91, %94 : vector<8x8xf32>
    %96 = math.exp %95 : vector<8x8xf32>
    %cst_60 = arith.constant dense<0.000000e+00> : vector<8xf32>
    %97 = vector.multi_reduction <add>, %96, %cst_60 [1] : vector<8x8xf32> to vector<8xf32>
    %98 = vector.shape_cast %97 : vector<8xf32> to vector<8x1xf32>
    %99 = tpu.reciprocal %98 {approx = true} : vector<8x1xf32> -> vector<8x1xf32>
    %100 = vector.broadcast %99 : vector<8x1xf32> to vector<8x8xf32>
    %101 = arith.mulf %96, %100 : vector<8x8xf32>
    %cst_61 = arith.constant dense<0.000000e+00> : vector<8x32xf32>
    %102 = tpu.matmul %101, %86, %cst_61 {dimension_numbers = #tpu.dot_dimension_numbers<[1], [0], [0], [1], [0, 0, 1, 1], [], []>} : vector<8x8xf32>, vector<8x32xf32>, vector<8x32xf32> -> vector<8x32xf32>
    %103 = vector.extract_strided_slice %18 {offsets = [0, 32], sizes = [8, 16], strides = [1, 1]} : vector<8x64xf32> to vector<8x16xf32>
    %104 = vector.extract_strided_slice %29 {offsets = [0, 32], sizes = [8, 16], strides = [1, 1]} : vector<8x64xf32> to vector<8x16xf32>
    %105 = vector.extract_strided_slice %57 {offsets = [0, 32], sizes = [8, 16], strides = [1, 1]} : vector<8x64xf32> to vector<8x16xf32>
    %106 = vector.extract_strided_slice %59 {offsets = [0, 64], sizes = [8, 32], strides = [1, 1]} : vector<8x128xf32> to vector<8x32xf32>
    %cst_62 = arith.constant dense<0.000000e+00> : vector<8x8xf32>
    %107 = tpu.matmul %103, %105, %cst_62 {dimension_numbers = #tpu.dot_dimension_numbers<[1], [1], [0], [0], [0, 0, 1, 0], [], []>} : vector<8x16xf32>, vector<8x16xf32>, vector<8x8xf32> -> vector<8x8xf32>
    %cst_63 = arith.constant dense<0.000000e+00> : vector<8x8xf32>
    %108 = tpu.matmul %104, %42, %cst_63 {dimension_numbers = #tpu.dot_dimension_numbers<[1], [1], [0], [0], [0, 0, 1, 0], [], []>} : vector<8x16xf32>, vector<8x16xf32>, vector<8x8xf32> -> vector<8x8xf32>
    %109 = arith.addf %107, %108 : vector<8x8xf32>
    %cst_64 = arith.constant -3.40282347E+38 : f32
    %110 = vector.broadcast %cst_64 : f32 to vector<8x8xf32>
    %111 = arith.select %62, %109, %110 : vector<8x8xi1>, vector<8x8xf32>
    %cst_65 = arith.constant dense<0xFF800000> : vector<8xf32>
    %112 = vector.multi_reduction <maximumf>, %111, %cst_65 [1] : vector<8x8xf32> to vector<8xf32>
    %113 = vector.shape_cast %112 : vector<8xf32> to vector<8x1xf32>
    %114 = vector.broadcast %113 : vector<8x1xf32> to vector<8x8xf32>
    %115 = arith.subf %111, %114 : vector<8x8xf32>
    %116 = math.exp %115 : vector<8x8xf32>
    %cst_66 = arith.constant dense<0.000000e+00> : vector<8xf32>
    %117 = vector.multi_reduction <add>, %116, %cst_66 [1] : vector<8x8xf32> to vector<8xf32>
    %118 = vector.shape_cast %117 : vector<8xf32> to vector<8x1xf32>
    %119 = tpu.reciprocal %118 {approx = true} : vector<8x1xf32> -> vector<8x1xf32>
    %120 = vector.broadcast %119 : vector<8x1xf32> to vector<8x8xf32>
    %121 = arith.mulf %116, %120 : vector<8x8xf32>
    %cst_67 = arith.constant dense<0.000000e+00> : vector<8x32xf32>
    %122 = tpu.matmul %121, %106, %cst_67 {dimension_numbers = #tpu.dot_dimension_numbers<[1], [0], [0], [1], [0, 0, 1, 1], [], []>} : vector<8x8xf32>, vector<8x32xf32>, vector<8x32xf32> -> vector<8x32xf32>
    %123 = vector.extract_strided_slice %18 {offsets = [0, 48], sizes = [8, 16], strides = [1, 1]} : vector<8x64xf32> to vector<8x16xf32>
    %124 = vector.extract_strided_slice %29 {offsets = [0, 48], sizes = [8, 16], strides = [1, 1]} : vector<8x64xf32> to vector<8x16xf32>
    %125 = vector.extract_strided_slice %57 {offsets = [0, 48], sizes = [8, 16], strides = [1, 1]} : vector<8x64xf32> to vector<8x16xf32>
    %126 = vector.extract_strided_slice %59 {offsets = [0, 96], sizes = [8, 32], strides = [1, 1]} : vector<8x128xf32> to vector<8x32xf32>
    %cst_68 = arith.constant dense<0.000000e+00> : vector<8x8xf32>
    %127 = tpu.matmul %123, %125, %cst_68 {dimension_numbers = #tpu.dot_dimension_numbers<[1], [1], [0], [0], [0, 0, 1, 0], [], []>} : vector<8x16xf32>, vector<8x16xf32>, vector<8x8xf32> -> vector<8x8xf32>
    %cst_69 = arith.constant dense<0.000000e+00> : vector<8x8xf32>
    %128 = tpu.matmul %124, %42, %cst_69 {dimension_numbers = #tpu.dot_dimension_numbers<[1], [1], [0], [0], [0, 0, 1, 0], [], []>} : vector<8x16xf32>, vector<8x16xf32>, vector<8x8xf32> -> vector<8x8xf32>
    %129 = arith.addf %127, %128 : vector<8x8xf32>
    %cst_70 = arith.constant -3.40282347E+38 : f32
    %130 = vector.broadcast %cst_70 : f32 to vector<8x8xf32>
    %131 = arith.select %62, %129, %130 : vector<8x8xi1>, vector<8x8xf32>
    %cst_71 = arith.constant dense<0xFF800000> : vector<8xf32>
    %132 = vector.multi_reduction <maximumf>, %131, %cst_71 [1] : vector<8x8xf32> to vector<8xf32>
    %133 = vector.shape_cast %132 : vector<8xf32> to vector<8x1xf32>
    %134 = vector.broadcast %133 : vector<8x1xf32> to vector<8x8xf32>
    %135 = arith.subf %131, %134 : vector<8x8xf32>
    %136 = math.exp %135 : vector<8x8xf32>
    %cst_72 = arith.constant dense<0.000000e+00> : vector<8xf32>
    %137 = vector.multi_reduction <add>, %136, %cst_72 [1] : vector<8x8xf32> to vector<8xf32>
    %138 = vector.shape_cast %137 : vector<8xf32> to vector<8x1xf32>
    %139 = tpu.reciprocal %138 {approx = true} : vector<8x1xf32> -> vector<8x1xf32>
    %140 = vector.broadcast %139 : vector<8x1xf32> to vector<8x8xf32>
    %141 = arith.mulf %136, %140 : vector<8x8xf32>
    %cst_73 = arith.constant dense<0.000000e+00> : vector<8x32xf32>
    %142 = tpu.matmul %141, %126, %cst_73 {dimension_numbers = #tpu.dot_dimension_numbers<[1], [0], [0], [1], [0, 0, 1, 1], [], []>} : vector<8x8xf32>, vector<8x32xf32>, vector<8x32xf32> -> vector<8x32xf32>
    %143 = tpu.concatenate %82, %102, %122, %142 in 1 : vector<8x32xf32>, vector<8x32xf32>, vector<8x32xf32>, vector<8x32xf32> -> vector<8x128xf32>
    %c0_74 = arith.constant 0 : index
    %c0_75 = arith.constant 0 : index
    %144 = vector.load %arg13[%c0_74, %c0_75] : memref<128x64xf32, #tpu.memory_space<vmem>>, vector<128x64xf32>
    %cst_76 = arith.constant dense<0.000000e+00> : vector<8x64xf32>
    %145 = tpu.matmul %143, %144, %cst_76 {dimension_numbers = #tpu.dot_dimension_numbers<[1], [0], [0], [1], [0, 0, 1, 1], [], []>} : vector<8x128xf32>, vector<128x64xf32>, vector<8x64xf32> -> vector<8x64xf32>
    %c0_77 = arith.constant 0 : index
    %c0_78 = arith.constant 0 : index
    %c0_79 = arith.constant 0 : index
    %146 = vector.load %arg18[%c0_77, %c0_78, %c0_79] : memref<1x8x64xf32, #tpu.memory_space<vmem>>, vector<1x8x64xf32>
    %147 = vector.shape_cast %146 : vector<1x8x64xf32> to vector<8x64xf32>
    %148 = vector.shape_cast %145 : vector<8x64xf32> to vector<1x8x64xf32>
    tpu.vector_store %arg18[%c0_77, %c0_78, %c0_79], %148 {strides = array<i32>} : memref<1x8x64xf32, #tpu.memory_space<vmem>>, vector<1x8x64xf32>,
    return
  }
  func.func @transform_0(%arg0: i32) -> (i32, i32, i32) {
    %c0_i32 = arith.constant 0 : i32
    %c0_i32_0 = arith.constant 0 : i32
    %c0_i32_1 = arith.constant 0 : i32
    return %arg0, %c0_i32, %c0_i32_0 : i32, i32, i32
  }
  func.func @transform_1(%arg0: i32) -> (i32, i32) {
    %c0_i32 = arith.constant 0 : i32
    %c0_i32_0 = arith.constant 0 : i32
    %c0_i32_1 = arith.constant 0 : i32
    return %c0_i32, %c0_i32_0 : i32, i32
  }
  func.func @transform_2(%arg0: i32) -> (i32, i32) {
    %c0_i32 = arith.constant 0 : i32
    %c0_i32_0 = arith.constant 0 : i32
    %c0_i32_1 = arith.constant 0 : i32
    return %c0_i32, %c0_i32_0 : i32, i32
  }
  func.func @transform_3(%arg0: i32) -> (i32, i32) {
    %c0_i32 = arith.constant 0 : i32
    %c0_i32_0 = arith.constant 0 : i32
    %c0_i32_1 = arith.constant 0 : i32
    return %c0_i32, %c0_i32_0 : i32, i32
  }
  func.func @transform_4(%arg0: i32) -> (i32, i32) {
    %c0_i32 = arith.constant 0 : i32
    %c0_i32_0 = arith.constant 0 : i32
    %c0_i32_1 = arith.constant 0 : i32
    return %c0_i32, %c0_i32_0 : i32, i32
  }
  func.func @transform_5(%arg0: i32) -> (i32, i32) {
    %c0_i32 = arith.constant 0 : i32
    %c0_i32_0 = arith.constant 0 : i32
    %c0_i32_1 = arith.constant 0 : i32
    return %c0_i32, %c0_i32_0 : i32, i32
  }
  func.func @transform_6(%arg0: i32) -> (i32, i32) {
    %c0_i32 = arith.constant 0 : i32
    %c0_i32_0 = arith.constant 0 : i32
    %c0_i32_1 = arith.constant 0 : i32
    return %c0_i32, %c0_i32_0 : i32, i32
  }
  func.func @transform_7(%arg0: i32) -> (i32, i32) {
    %c0_i32 = arith.constant 0 : i32
    %c0_i32_0 = arith.constant 0 : i32
    %c0_i32_1 = arith.constant 0 : i32
    return %c0_i32, %c0_i32_0 : i32, i32
  }
  func.func @transform_8(%arg0: i32) -> (i32, i32) {
    %c0_i32 = arith.constant 0 : i32
    %c0_i32_0 = arith.constant 0 : i32
    %c0_i32_1 = arith.constant 0 : i32
    return %c0_i32, %c0_i32_0 : i32, i32
  }
  func.func @transform_9(%arg0: i32) -> (i32, i32) {
    %c0_i32 = arith.constant 0 : i32
    %c0_i32_0 = arith.constant 0 : i32
    %c0_i32_1 = arith.constant 0 : i32
    return %c0_i32, %c0_i32_0 : i32, i32
  }
  func.func @transform_10(%arg0: i32) -> (i32, i32) {
    %c0_i32 = arith.constant 0 : i32
    %c0_i32_0 = arith.constant 0 : i32
    %c0_i32_1 = arith.constant 0 : i32
    return %c0_i32, %c0_i32_0 : i32, i32
  }
  func.func @transform_11(%arg0: i32) -> (i32, i32) {
    %c0_i32 = arith.constant 0 : i32
    %c0_i32_0 = arith.constant 0 : i32
    %c0_i32_1 = arith.constant 0 : i32
    return %c0_i32, %c0_i32_0 : i32, i32
  }
  func.func @transform_12(%arg0: i32) -> (i32, i32) {
    %c0_i32 = arith.constant 0 : i32
    %c0_i32_0 = arith.constant 0 : i32
    %c0_i32_1 = arith.constant 0 : i32
    return %c0_i32, %c0_i32_0 : i32, i32
  }
  func.func @transform_13(%arg0: i32) -> (i32, i32, i32) {
    %c0_i32 = arith.constant 0 : i32
    %c0_i32_0 = arith.constant 0 : i32
    %c0_i32_1 = arith.constant 0 : i32
    return %arg0, %c0_i32, %c0_i32_0 : i32, i32, i32
  }
  func.func @transform_14(%arg0: i32) -> (i32, i32, i32) {
    %c0_i32 = arith.constant 0 : i32
    %c0_i32_0 = arith.constant 0 : i32
    %c0_i32_1 = arith.constant 0 : i32
    return %arg0, %c0_i32, %c0_i32_0 : i32, i32, i32
  }
  func.func @transform_15(%arg0: i32) -> (i32, i32, i32) {
    %c0_i32 = arith.constant 0 : i32
    %c0_i32_0 = arith.constant 0 : i32
    %c0_i32_1 = arith.constant 0 : i32
    return %arg0, %c0_i32, %c0_i32_0 : i32, i32, i32
  }
  func.func @transform_16(%arg0: i32) -> (i32, i32, i32) {
    %c0_i32 = arith.constant 0 : i32
    %c0_i32_0 = arith.constant 0 : i32
    %c0_i32_1 = arith.constant 0 : i32
    return %arg0, %c0_i32, %c0_i32_0 : i32, i32, i32
  }
  func.func @transform_17(%arg0: i32) -> (i32, i32, i32) {
    %c0_i32 = arith.constant 0 : i32
    %c0_i32_0 = arith.constant 0 : i32
    %c0_i32_1 = arith.constant 0 : i32
    return %arg0, %c0_i32, %c0_i32_0 : i32, i32, i32
  }
}

</mosaic_0001>

<bundles_post_ra>
// kernel: tile.14
= control target key start
LH: loop header
LB: loop body
LE: loop exit
PB: predicated region body
PF: predicated region fallthrough
CT: control target
= control target key end

     0   :  { %vm68_vm0 = vcmask 1047556   ;;  %s167_s9 = smov 32   ;;  %s168_s10 = smov 16   ;;  %vm70_vm1 = vcmask 130048   ;;  %vm89_vm2 = vcmask 523648   ;;  %vm110_vm3 = vcmask 392448   ;;  %s259_s0 = inlined_call_operand.vmem [shape: f32[2,8,4,16], index: 0, kind: input, shape index: {}]   ;;  %s260_s1 = inlined_call_operand.vmem [shape: f32[2,8,64], index: 1, kind: output, shape index: {}]  }
   0x1   :  { %v152_v0 = vld [vmem:[%s259_s0 + $0x1c] sm:$0xf]  ;;  %v153_v1 = vld [vmem:[%s259_s0 + $0x18] sm:$0xf]  ;;  %v154_v2 = vld [vmem:[%s259_s0 + $0x14] sm:$0xf] }
   0x2   :  { %39 = vst [vmem:[#allocation0 + $0x38] sm:$0xf] %v152_v0  ;;  %v155_v3 = vld [vmem:[%s259_s0 + $0x10] sm:$0xf]  ;;  %v156_v4 = vld [vmem:[%s259_s0 + $0xc] sm:$0xf] }
   0x3   :  { %43 = vst [vmem:[#allocation0 + $0x30] sm:$0xf] %v153_v1  ;;  %v157_v5 = vld [vmem:[%s259_s0 + $0x8] sm:$0xf]  ;;  %v158_v6 = vld [vmem:[%s259_s0 + $0x4] sm:$0xf] }
   0x4   :  { %47 = vst [vmem:[#allocation0 + $0x28] sm:$0xf] %v154_v2  ;;  %v64_v7 = vld [vmem:[%s259_s0] sm:$0xf]  ;;  %v144_v8 = vld [vmem:[%s259_s0 + $0x3c] sm:$0xf] }
   0x5   :  { %51 = vst [vmem:[#allocation0 + $0x20] sm:$0xf] %v155_v3  ;;  %v145_v9 = vld [vmem:[%s259_s0 + $0x38] sm:$0xf]  ;;  %v146_v10 = vld [vmem:[%s259_s0 + $0x34] sm:$0xf] }
   0x6   :  { %55 = vst [vmem:[#allocation0 + $0x18] sm:$0xf] %v156_v4  ;;  %v147_v11 = vld [vmem:[%s259_s0 + $0x30] sm:$0xf]  ;;  %v148_v12 = vld [vmem:[%s259_s0 + $0x2c] sm:$0xf] }
   0x7   :  { %59 = vst [vmem:[#allocation0 + $0x10] sm:$0xf] %v157_v5  ;;  %v149_v13 = vld [vmem:[%s259_s0 + $0x28] sm:$0xf]  ;;  %v150_v15 = vld [vmem:[%s259_s0 + $0x24] sm:$0xf] }
   0x8   :  { %63 = vst [vmem:[#allocation0 + $0x8] sm:$0xf] %v158_v6  ;;  %v151_v17 = vld [vmem:[%s259_s0 + $0x20] sm:$0xf]  ;;  %s166_s0 = smov 48   ;;  %vm131_vm4 = vcmask 261248  }
   0x9   :  { %65 = vst [vmem:[#allocation0] sm:$0xf] %v64_v7 }
   0xa   :  { %7 = vst [vmem:[#allocation0 + $0x78] sm:$0xf] %v144_v8 }
   0xb   :  { %11 = vst [vmem:[#allocation0 + $0x70] sm:$0xf] %v145_v9 }
   0xc   :  { %v84_v14 = vld [vmem:[#allocation0 + $0x3] ss:$8 sm:$0xf0]   ;;  %15 = vst [vmem:[#allocation0 + $0x68] sm:$0xf] %v146_v10 }
   0xd   :  { %v105_v16 = vld [vmem:[#allocation0 + $0x2] ss:$8 sm:$0xf0]   ;;  %19 = vst [vmem:[#allocation0 + $0x60] sm:$0xf] %v147_v11 }
   0xe   :  { %23 = vst [vmem:[#allocation0 + $0x58] sm:$0xf] %v148_v12  ;;  %v126_v18 = vld [vmem:[#allocation0 + $0x1] ss:$8 sm:$0xf0]  }
   0xf   :  { %27 = vst [vmem:[#allocation0 + $0x50] sm:$0xf] %v149_v13  ;;  %v67_v35 = vld [vmem:[#allocation0] ss:$8 sm:$0xf0]  }
  0x10   :  { %v82_v19 = vld [vmem:[#allocation0 + $0x3] ss:$8 sm:$0xf]   ;;  %v103_v20 = vld [vmem:[#allocation0 + $0x2] ss:$8 sm:$0xf]  }
  0x11   :  { %v86_v21 = vsel %vm68_vm0, %v84_v14, %v82_v19  ;;  %v107_v22 = vsel %vm68_vm0, %v105_v16, %v103_v20  ;;  %v124_v23 = vld [vmem:[#allocation0 + $0x1] ss:$8 sm:$0xf]   ;;  %31 = vst [vmem:[#allocation0 + $0x48] sm:$0xf] %v150_v15 }
  0x12   :  { %87 = vrot.lane.b32.xlu0 %v86_v21, %s166_s0  ;;  %108 = vrot.lane.b32.xlu1 %v107_v22, %s167_s9  ;;  %v128_v24 = vsel %vm68_vm0, %v126_v18, %v124_v23  ;;  %35 = vst [vmem:[#allocation0 + $0x40] sm:$0xf] %v151_v17  ;;  %v66_v34 = vld [vmem:[#allocation0] ss:$8 sm:$0xf]  }
  0x13   :  { %129 = vrot.lane.b32.xlu2 %v128_v24, %s168_s10  ;;  %v69_v36 = vsel %vm68_vm0, %v67_v35, %v66_v34 }
  0x14   :  { %v94_v25 = vld [vmem:[#allocation0 + $0x43] ss:$8 sm:$0xf0]   ;;  %v115_v26 = vld [vmem:[#allocation0 + $0x42] ss:$8 sm:$0xf0]  }
  0x15   :  { %v136_v27 = vld [vmem:[#allocation0 + $0x41] ss:$8 sm:$0xf0]   ;;  %71 = vst.msk [vmem:[%s260_s1] sm:$0xff] %vm70_vm1, %v69_v36  }
  0x16   :  { %v75_v38 = vld [vmem:[#allocation0 + $0x40] ss:$8 sm:$0xf0]  }
  0x19   :  { %v92_v28 = vld [vmem:[#allocation0 + $0x43] ss:$8 sm:$0xf]   ;;  %v113_v29 = vld [vmem:[#allocation0 + $0x42] ss:$8 sm:$0xf]  }
  0x1a   :  { %v96_v30 = vsel %vm68_vm0, %v94_v25, %v92_v28  ;;  %v117_v31 = vsel %vm68_vm0, %v115_v26, %v113_v29  ;;  %v134_v32 = vld [vmem:[#allocation0 + $0x41] ss:$8 sm:$0xf]   ;;  %v73_v37 = vld [vmem:[#allocation0 + $0x40] ss:$8 sm:$0xf]  }
  0x1b   :  { %97 = vrot.lane.b32.xlu0 %v96_v30, %s166_s0  ;;  %118 = vrot.lane.b32.xlu1 %v117_v31, %s167_s9  ;;  %v138_v33 = vsel %vm68_vm0, %v136_v27, %v134_v32  ;;  %v77_v40 = vsel %vm68_vm0, %v75_v38, %v73_v37 }
  0x1c   :  { %139 = vrot.lane.b32.xlu2 %v138_v33, %s168_s10  ;;  %159 = vst.msk [vmem:[%s260_s1 + $0x8] sm:$0xff] %vm70_vm1, %v77_v40  }
  0x6d   :  { %v130_v39 = vpop.permute.xlu2 %129  }
  0x76   :  { %v140_v41 = vpop.permute.xlu2 %139  }
  0x84   :  { %v88_v42 = vpop.permute.xlu0 %87   ;;  %v109_v43 = vpop.permute.xlu1 %108  }
  0x85   :  { %90 = vst.msk [vmem:[%s260_s1] sm:$0xff] %vm89_vm2, %v88_v42  }
  0x86   :  { %111 = vst.msk [vmem:[%s260_s1] sm:$0xff] %vm110_vm3, %v109_v43  }
  0x87   :  { %132 = vst.msk [vmem:[%s260_s1] sm:$0xff] %vm131_vm4, %v130_v39  }
  0x8d   :  { %v98_v44 = vpop.permute.xlu0 %97   ;;  %v119_v45 = vpop.permute.xlu1 %118  }
  0x8e   :  { %160 = vst.msk [vmem:[%s260_s1 + $0x8] sm:$0xff] %vm89_vm2, %v98_v44  }
  0x8f   :  { %161 = vst.msk [vmem:[%s260_s1 + $0x8] sm:$0xff] %vm110_vm3, %v119_v45  }
  0x90   :  { %162 = vst.msk [vmem:[%s260_s1 + $0x8] sm:$0xff] %vm131_vm4, %v140_v41  }

// kernel: gfr2_mla_forward.1
= control target key start
LH: loop header
LB: loop body
LE: loop exit
PB: predicated region body
PF: predicated region fallthrough
CT: control target
= control target key end

     0   :  { %s2165_s0 = inlined_call_operand.vmem [shape: f32[2,8,64], index: 0, kind: input, shape index: {}]   ;;  %s2166_s1 = inlined_call_operand.vmem [shape: f32[64,32], index: 1, kind: input, shape index: {}]   ;;  %s2167_s2 = inlined_call_operand.vmem [shape: f32[1,32], index: 2, kind: input, shape index: {}]   ;;  %s2168_s3 = inlined_call_operand.vmem [shape: f32[32,64], index: 3, kind: input, shape index: {}]   ;;  %s2169_s4 = inlined_call_operand.vmem [shape: f32[32,64], index: 4, kind: input, shape index: {}]   ;;  %s2170_s5 = inlined_call_operand.vmem [shape: f32[32,64], index: 5, kind: input, shape index: {}]   ;;  %s2171_s6 = inlined_call_operand.vmem [shape: f32[64,32], index: 6, kind: input, shape index: {}]   ;;  %s2172_s7 = inlined_call_operand.vmem [shape: f32[64,16], index: 7, kind: input, shape index: {}]   ;;  %s2173_s8 = inlined_call_operand.vmem [shape: f32[64,16], index: 8, kind: input, shape index: {}]   ;;  %s2174_s9 = inlined_call_operand.vmem [shape: f32[1,32], index: 9, kind: input, shape index: {}]   ;;  %s2175_s10 = inlined_call_operand.vmem [shape: f32[32,64], index: 10, kind: input, shape index: {}]   ;;  %s2176_s11 = inlined_call_operand.vmem [shape: f32[32,128], index: 11, kind: input, shape index: {}]   ;;  %s2177_s12 = inlined_call_operand.vmem [shape: f32[128,64], index: 12, kind: input, shape index: {}]   ;;  %s2178_s13 = inlined_call_operand.vmem [shape: f32[2,8,64], index: 13, kind: input, shape index: {}]   ;;  %s2179_s14 = inlined_call_operand.vmem [shape: f32[2,8,64], index: 14, kind: input, shape index: {}]   ;;  %s2180_s15 = inlined_call_operand.vmem [shape: f32[2,8,16], index: 15, kind: input, shape index: {}]   ;;  %s2181_s16 = inlined_call_operand.vmem [shape: f32[2,8,16], index: 16, kind: input, shape index: {}]   ;;  %s2182_s17 = inlined_call_operand.hbm [shape: f32[2,8,64], index: 17, kind: output, shape index: {}]  }
   0x1   :  { %2193 = sst [smem:[#allocation11_spill]] %s2165_s0 }
   0x2   :  { %2194 = sst [smem:[#allocation12_spill]] %s2166_s1 }
   0x3   :  { %2195 = sst [smem:[#allocation13_spill]] %s2167_s2 }
   0x4   :  { %2196 = sst [smem:[#allocation14_spill]] %s2168_s3 }
   0x5   :  { %2197 = sst [smem:[#allocation15_spill]] %s2182_s17 }
   0x6   :  { %22 = vsyncpa [#allocation3], 0 }
   0x7   :  { %24 = vsyncpa [#allocation3 + $0x1], 0  ;;  %s1730_s24 = smov 0   ;;  %s1732_s25 = smov 0  }
   0x8   :  { %s1734_s26 = smov 0   ;;  %s1736_s27 = smov 0  }
   0x9 LB: > { %2198 = sst [smem:[#allocation5_spill]] %s1620_s24  ;;  %s1751_s28 = sadd.s32 4294967295, %s1632_s27   ;;  %s1632_s27 = sphi %s1736_s27, %s2215_s27   ;;  %s1628_s26 = sphi %s1734_s26, %s2220_s26   ;;  %s1624_s25 = sphi %s1732_s25, %s2219_s25   ;;  %s1620_s24 = sphi %s1730_s24, %s2218_s24  }
   0xa   : > { %2199 = sst [smem:[#allocation6_spill]] %s1628_s26  ;;  %s1458_s29 = sadd.s32 4294967294, %s1632_s27  }
   0xb   : > { %2200 = sst [smem:[#allocation7_spill]] %s1632_s27  ;;  %s1755_s0 = sadd.s32 1, %s1632_s27  }
   0xc   : > { %2201 = sst [smem:[#allocation8_spill]] %s1755_s0  ;;  %s419_s30 = sadd.s32 1, %s1628_s26 }
   0xd   : > { %s416_s18 = ssub.s32 %s1632_s27, %s1755_s0  ;;  %p429_p0 = scmp.ne.s32.totalorder %s1628_s26, %s1624_s25 }
   0xe   : > { %p417_p1 = scmp.eq.s32.totalorder %s416_s18, 0  ;;  %p430_p2 = scmp.eq.s32.totalorder %s1751_s28, 1 }
   0xf   : > { %p435_p3 = scmp.ne.s32.totalorder %s1624_s25, %s1620_s24  ;;  %p436_p4 = scmp.eq.s32.totalorder %s1458_s29, 1 }
  0x10   : > { %s1766_s19 = scalar_select %p417_p1, %s1628_s26, %s419_s30  }
  0x11   : > { %p1768_p5 = por %p430_p2, %p429_p0  ;;  %p1772_p6 = por %p436_p4, %p435_p3 }
  0x12   : > { %2202 = sst [smem:[#allocation9_spill]] %s1766_s19  ;;  %p1461_p7 = scmp.ge.s32.totalorder %s1632_s27, 1 }
  0x13   : > { %s2204_s20 = scalar_select %p1772_p6, 1, 0 }
  0x14   : > { %p525_p8 = scmp.lt.s32.totalorder %s1632_s27, 3 }
  0x15   : > { %2205 = sst [smem:[#allocation10_spill]] %s2204_s20 }
  0x16   : > { %p526_p9 = pnand %p1461_p7, %p525_p8 }
  0x17   : > { %s2206_s23 = sld [smem:[#allocation12_spill]] (!%p526_p9)  ;;  %p592_p10 = scmp.lt.s32.totalorder (!%p526_p9), %s1751_s28, 1 }
  0x18   : > { %529 = sbr.rel (%p526_p9) target bundleno = 2002 (0x7d2), region = 88  ;;  %s2207_s27 = sld [smem:[#allocation11_spill]] (!%p526_p9) }
  0x19   : > { %s2208_s3 = sld [smem:[#allocation14_spill]] (!%p526_p9)  ;;  %s2191_s20 = smov (!%p526_p9), 112  }
  0x1a   : > { %s2209_s2 = sld [smem:[#allocation13_spill]] (!%p526_p9)  ;;  %s1639_s30 = smov (!%p526_p9), 32  }
  0x1b   : > { %s2211_s0 = sld [smem:[#allocation15_spill]] (!%p526_p9) }
  0x1d   : > { %v620_v0 = vld [vmem:[%s2206_s23 + $0x38] sm:$0xff]  ;;  %v619_v1 = vld [vmem:[%s2206_s23 + $0x30] sm:$0xff]  ;;  %v618_v2 = vld [vmem:[%s2206_s23 + $0x28] sm:$0xff]  ;;  %s593_s26 = scalar_select %p592_p10, %s1751_s28, 1  ;;  %vm621_vm0 = vcmask 523264   ;;  %vm647_vm1 = vcmask 261120  }
  0x1e   : > { %633 = vmatpush.msra.mxu0 %v620_v0  ;;  %v617_v3 = vld [vmem:[%s2206_s23 + $0x20] sm:$0xff]  ;;  %v616_v4 = vld [vmem:[%s2206_s23 + $0x18] sm:$0xff]  ;;  %v615_v5 = vld [vmem:[%s2206_s23 + $0x10] sm:$0xff]  ;;  %v1634_v12 = vmov 32.0   ;;  %vm922_vm6 = vcmask 130048   ;;  %vm976_vm11 = vcmask 64512  }
  0x1f   : > { %s1795_s29 = sshll.u32 %s593_s26, 3  ;;  %v614_v6 = vld [vmem:[%s2206_s23 + $0x8] sm:$0xff]  ;;  %v613_v7 = vld [vmem:[%s2206_s23] sm:$0xff]  ;;  %1548 = vrcp.f32 %v1634_v12  ;;  %v705_v13 = vld [vmem:[%s2169_s4 + $0x18] sm:$0xff]  ;;  %s1636_s26 = smov 96   ;;  %vm1296_vm12 = vcmask 785408  }
  0x20   : > { %634 = vmatpush.msra.mxu0 %v619_v1  ;;  %s595_s17 = scalar_lea.vmem %s2207_s27, %s1795_s29  ;;  %718 = vmatpush.msra.mxu2 %v705_v13  ;;  %v704_v14 = vld [vmem:[%s2169_s4 + $0x10] sm:$0xff]  ;;  %v703_v15 = vld [vmem:[%s2169_s4 + $0x8] sm:$0xff]  ;;  %v702_v17 = vld [vmem:[%s2169_s4] sm:$0xff]  ;;  %s607_s24 = scalar_lea.vmem %s2180_s15, %s1795_s29 }
  0x21   : > { %v1810_v8 = vld [vmem:[%s595_s17] sm:$0xff]  ;;  %v762_v18 = vld [vmem:[%s2171_s6 + $0x38] sm:$0xff]  ;;  %v761_v21 = vld [vmem:[%s2171_s6 + $0x30] sm:$0xff]  ;;  %s611_s27 = scalar_lea.vmem %s2181_s16, %s1795_s29  ;;  %s603_s18 = scalar_lea.vmem %s2179_s14, %s1795_s29 }
  0x22   : > { %635 = vmatpush.msra.mxu0 %v618_v2  ;;  %719 = vmatpush.msra.mxu2 %v704_v14  ;;  %v678_v19 = vld [vmem:[%s2208_s3 + $0x18] sm:$0xff]  ;;  %v677_v22 = vld [vmem:[%s2208_s3 + $0x10] sm:$0xff]  ;;  %v760_v23 = vld [vmem:[%s2171_s6 + $0x28] sm:$0xff]  ;;  %s1637_s17 = smov 80  }
  0x23   : > { %694 = vmatpush.msra.mxu3 %v678_v19  ;;  %v676_v24 = vld [vmem:[%s2208_s3 + $0x8] sm:$0xff]  ;;  %v759_v26 = vld [vmem:[%s2171_s6 + $0x20] sm:$0xff]  ;;  %v729_v28 = vld [vmem:[%s2170_s5 + $0x18] sm:$0xff] }
  0x24   : > { %636 = vmatpush.msra.mxu0 %v617_v3  ;;  %720 = vmatpush.msra.mxu2 %v703_v15  ;;  %v675_v27 = vld [vmem:[%s2208_s3] sm:$0xff]  ;;  %v758_v29 = vld [vmem:[%s2171_s6 + $0x18] sm:$0xff]  ;;  %v728_v30 = vld [vmem:[%s2170_s5 + $0x10] sm:$0xff] }
  0x25   : > { %v1549_v16 = vpop.eup %1548  ;;  %695 = vmatpush.msra.mxu3 %v677_v22  ;;  %v757_v31 = vld [vmem:[%s2171_s6 + $0x10] sm:$0xff]  ;;  %v727_v33 = vld [vmem:[%s2170_s5 + $0x8] sm:$0xff]  ;;  %v726_v36 = vld [vmem:[%s2170_s5] sm:$0xff] }
  0x26   : > { %637 = vmatpush.msra.mxu0 %v616_v4  ;;  %721 = vmatpush.msra.mxu2 %v702_v17  ;;  %v652_v20 = vmul.f32 32.0, %v1549_v16  ;;  %v756_v34 = vld [vmem:[%s2171_s6 + $0x8] sm:$0xff]  ;;  %v755_v37 = vld [vmem:[%s2171_s6] sm:$0xff]  ;;  %vm656_vm2 = vweird.f32 %v1549_v16  ;;  %v790_v52 = vld [vmem:[%s2172_s7 + $0x38] sm:$0xff] }
  0x27   : > { %696 = vmatpush.msra.mxu3 %v676_v24  ;;  %v1546_v48 = vld [vmem:[%s2209_s2] ss:$0 sm:$0xff]  ;;  %v818_v53 = vld [vmem:[%s2173_s8 + $0x38] sm:$0xff]  ;;  %v789_v54 = vld [vmem:[%s2172_s7 + $0x30] sm:$0xff]  ;;  %s599_s2 = scalar_lea.vmem %s2178_s13, %s1795_s29 }
  0x28   : > { %638 = vmatpush.msra.mxu0 %v615_v5  ;;  %771 = vmatpush.msrb.mxu2 %v762_v18  ;;  %v653_v25 = vsub.f32 1.0, %v652_v20  ;;  %v817_v55 = vld [vmem:[%s2173_s8 + $0x30] sm:$0xff]  ;;  %v788_v56 = vld [vmem:[%s2172_s7 + $0x28] sm:$0xff]  ;;  %v787_v58 = vld [vmem:[%s2172_s7 + $0x20] sm:$0xff] }
  0x29   : > { %697 = vmatpush.msra.mxu3 %v675_v27  ;;  %v816_v57 = vld [vmem:[%s2173_s8 + $0x28] sm:$0xff]  ;;  %v815_v59 = vld [vmem:[%s2173_s8 + $0x20] sm:$0xff]  ;;  %v786_v60 = vld [vmem:[%s2172_s7 + $0x18] sm:$0xff] }
  0x2a   : > { %639 = vmatpush.msra.mxu0 %v614_v6  ;;  %772 = vmatpush.msrb.mxu2 %v761_v21  ;;  %v654_v32 = vmul.f32 %v1549_v16, %v653_v25  ;;  %v814_v61 = vld [vmem:[%s2173_s8 + $0x18] sm:$0xff]  ;;  %v785_v62 = vld [vmem:[%s2172_s7 + $0x10] sm:$0xff]  ;;  %v784_v0 = vld [vmem:[%s2172_s7 + $0x8] sm:$0xff] }
  0x2b   : > { %742 = vmatpush.msrb.mxu3 %v729_v28  ;;  %v813_v63 = vld [vmem:[%s2173_s8 + $0x10] sm:$0xff]  ;;  %v812_v1 = vld [vmem:[%s2173_s8 + $0x8] sm:$0xff]  ;;  %v783_v2 = vld [vmem:[%s2172_s7] sm:$0xff] }
  0x2c   : > { %640 = vmatpush.msra.mxu0 %v613_v7  ;;  %773 = vmatpush.msrb.mxu2 %v760_v23  ;;  %v655_v35 = vadd.f32 %v1549_v16, %v654_v32  ;;  %v811_v3 = vld [vmem:[%s2173_s8] sm:$0xff]  ;;  %v869_v22 = vld [vmem:[%s2175_s10 + $0x18] sm:$0xff]  ;;  %v868_v23 = vld [vmem:[%s2175_s10 + $0x10] sm:$0xff] }
  0x2d   : > { %1468 = vmatmul.msk.f32.vlgmr.msra.gmra.mxu0 %vm621_vm0, %v1810_v8  ;;  %743 = vmatpush.msrb.mxu3 %v728_v30  ;;  %v752_v12 = vld [vmem:[%s603_s18] sm:$0xff]  ;;  %v867_v24 = vld [vmem:[%s2175_s10 + $0x8] sm:$0xff]  ;;  %v895_v27 = vld [vmem:[%s2176_s11 + $0x10] sm:$0xff] }
  0x2e   : > { %774 = vmatpush.msrb.mxu2 %v759_v26  ;;  %v1879_v38 = vsel %vm656_vm2, %v1549_v16, %v655_v35  ;;  %v750_v15 = vld [vmem:[%s599_s2] sm:$0xff]  ;;  %885 = vmatpush.msrb.mxu0 %v869_v22  ;;  %v896_v26 = vld [vmem:[%s2176_s11 + $0x18] sm:$0xff]  ;;  %v894_v28 = vld [vmem:[%s2176_s11 + $0x8] sm:$0xff] }
  0x2f   : > { %744 = vmatpush.msrb.mxu3 %v727_v33  ;;  %v866_v25 = vld [vmem:[%s2175_s10] sm:$0xff] }
  0x30   : > { %775 = vmatpush.msrb.mxu2 %v758_v29  ;;  %886 = vmatpush.msrb.mxu0 %v868_v23  ;;  %v893_v29 = vld [vmem:[%s2176_s11] sm:$0xff] }
  0x31   : > { %745 = vmatpush.msrb.mxu3 %v726_v36 }
  0x32   : > { %776 = vmatpush.msrb.mxu2 %v757_v31  ;;  %887 = vmatpush.msrb.mxu0 %v867_v24 }
  0x34   : > { %777 = vmatpush.msrb.mxu2 %v756_v34  ;;  %888 = vmatpush.msrb.mxu0 %v866_v25 }
  0x36   : > { %778 = vmatpush.msrb.mxu2 %v755_v37  ;;  %909 = vmatpush.msra.mxu0 %v896_v26 }
  0x38   : > { %910 = vmatpush.msra.mxu0 %v895_v27 }
  0x3a   : > { %911 = vmatpush.msra.mxu0 %v894_v28 }
  0x3c   : > { %912 = vmatpush.msra.mxu0 %v893_v29 }
  0xaa   : > { %v1814_v9 = vpop.f32.mrf.mxu0 }
  0xab   : > { %v646_v10 = vmul.f32 %v1814_v9, %v1814_v9 }
  0xad   : > { %v648_v11 = vsel %vm647_vm1, %v646_v10, 0.0 }
  0xae   : > { %649 = vadd.xlane.f32.xlu0 %v648_v11  ;;  %v841_v11 = vld [vmem:[%s611_s27] sm:$0xff]  ;;  %s1638_s27 = smov 64  }
 0x121   : > { %v650_v39 = vpop.xlane.xlu0 %649 }
 0x122   : > { %v658_v40 = vmul.f32 %v1879_v38, %v650_v39 }
 0x124   : > { %v659_v41 = vadd.f32 1e-06, %v658_v40  ;;  %v1547_v40 = vld [vmem:[%s2174_s9] ss:$0 sm:$0xff] }
 0x126   : > { %1550 = vrsqrt.f32 %v659_v41  ;;  %vm666_vm4 = vweird.f32 %v659_v41 }
 0x12c   : > { %v1551_v42 = vpop.eup %1550 }
 0x12d   : > { %v661_v43 = vmul.f32 %v1551_v42, %v659_v41  ;;  %vm667_vm3 = vweird.f32 %v1551_v42 }
 0x12e   : > { %vm668_vm5 = vmor %vm666_vm4, %vm667_vm3 }
 0x12f   : > { %v662_v44 = vmul.f32 %v1551_v42, %v661_v43 }
 0x131   : > { %v663_v45 = vmul.f32 0.5, %v662_v44 }
 0x133   : > { %v664_v46 = vsub.f32 1.5, %v663_v45 }
 0x135   : > { %v665_v47 = vmul.f32 %v1551_v42, %v664_v46 }
 0x137   : > { %v669_v49 = vsel %vm668_vm5, %v1551_v42, %v665_v47 }
 0x138   : > { %v670_v50 = vmul.f32 %v669_v49, %v1814_v9 }
 0x13a   : > { %v674_v51 = vmul.f32 %v1546_v48, %v670_v50  ;;  %v917_v48 = vlaneseq }
 0x13c   : > { %1469 = vmatmul.msk.f32.vlgmr.msra.gmra.mxu3 %vm647_vm1, %v674_v51  ;;  %1470 = vmatmul.msk.f32.vlgmr.msra.gmra.mxu2 %vm647_vm1, %v674_v51 }
 0x13d   : > { %799 = vmatpush.msra.mxu2 %v790_v52  ;;  %827 = vmatpush.msra.mxu3 %v818_v53  ;;  %v2030_v52 = vand.u32 127, %v917_v48 }
 0x13f   : > { %800 = vmatpush.msra.mxu2 %v789_v54  ;;  %828 = vmatpush.msra.mxu3 %v817_v55 }
 0x141   : > { %801 = vmatpush.msra.mxu2 %v788_v56  ;;  %829 = vmatpush.msra.mxu3 %v816_v57 }
 0x143   : > { %802 = vmatpush.msra.mxu2 %v787_v58  ;;  %830 = vmatpush.msra.mxu3 %v815_v59 }
 0x144   : > { %1471 = vmatmul.msk.f32.vlgmr.msrb.gmra.mxu3 %vm647_vm1, %v674_v51  ;;  %1472 = vmatmul.msk.f32.vlgmr.msrb.gmra.mxu2 %vm621_vm0, %v1810_v8  ;;  %v2028_v51 = vshrl.u32 %v917_v48, 7 }
 0x145   : > { %803 = vmatpush.msra.mxu2 %v786_v60  ;;  %831 = vmatpush.msra.mxu3 %v814_v61 }
 0x146   : > { %vm921_vm10 = vcmp.le.s32.totalorder %v2030_v52, %v2028_v51  ;;  %v1313_v51 = vld [vmem:[%s2177_s12 + $0x78] sm:$0xff]  ;;  %v1311_v52 = vld [vmem:[%s2177_s12 + $0x68] sm:$0xff] }
 0x147   : > { %804 = vmatpush.msra.mxu2 %v785_v62  ;;  %832 = vmatpush.msra.mxu3 %v813_v63 }
 0x149   : > { %805 = vmatpush.msra.mxu2 %v784_v0  ;;  %833 = vmatpush.msra.mxu3 %v812_v1 }
 0x14b   : > { %806 = vmatpush.msra.mxu2 %v783_v2  ;;  %834 = vmatpush.msra.mxu3 %v811_v3 }
 0x14c   : > { %1473 = vmatmul.msk.f32.vlgmr.msra.gmra.mxu2 %vm621_vm0, %v1810_v8  ;;  %1474 = vmatmul.msk.f32.vlgmr.msra.gmra.mxu3 %vm621_vm0, %v1810_v8  ;;  %v839_v8 = vld [vmem:[%s607_s24] sm:$0xff]  ;;  %s2210_s24 = smov 112  }
 0x1bf   : > { %v1943_v4 = vpop.f32.mrf.mxu3  ;;  %v723_v5 = vpop.f32.mrf.mxu2 }
 0x1c0   : > { %1035 = vrot.lane.b32.xlu2 %v1943_v4, %s2191_s20  ;;  %v751_v20 = vmul.f32 %v750_v15, %v723_v5 }
 0x1c7   : > { %v747_v6 = vpop.f32.mrf.mxu3  ;;  %v780_v7 = vpop.f32.mrf.mxu2 }
 0x1c8   : > { %v845_v9 = vmul.f32 %v780_v7, %v780_v7  ;;  %v753_v18 = vmul.f32 %v752_v12, %v747_v6 }
 0x1ca   : > { %v846_v10 = vsel %vm647_vm1, %v845_v9, 0.0  ;;  %v1968_v21 = vadd.f32 %v753_v18, %v751_v20 }
 0x1cb   : > { %847 = vadd.xlane.f32.xlu0 %v846_v10 }
 0x1cf   : > { %v808_v13 = vpop.f32.mrf.mxu2  ;;  %v836_v14 = vpop.f32.mrf.mxu3 }
 0x1d0   : > { %v840_v16 = vmul.f32 %v839_v8, %v808_v13  ;;  %v842_v17 = vmul.f32 %v841_v11, %v836_v14 }
 0x1d2   : > { %v1964_v19 = vadd.f32 %v842_v17, %v840_v16 }
 0x1d4   : > { %1477 = vmatpush.xpose.msk.msra.mxu1 %vm922_vm6, %v1964_v19 }
 0x1d7   : > { %1478 = vmatmul.msk.f32.vlgmr.msra.gmra.mxu1 %vm922_vm6, %v1968_v21 }
 0x21a   : > { %v1036_v46 = vpop.permute.xlu2 %1035 }
 0x23e   : > { %v848_v30 = vpop.xlane.xlu0 %847 }
 0x23f   : > { %v849_v31 = vmul.f32 %v848_v30, %v1879_v38 }
 0x241   : > { %v850_v32 = vadd.f32 1e-06, %v849_v31 }
 0x243   : > { %1552 = vrsqrt.f32 %v850_v32  ;;  %vm857_vm8 = vweird.f32 %v850_v32 }
 0x249   : > { %v1553_v33 = vpop.eup %1552 }
 0x24a   : > { %v852_v34 = vmul.f32 %v1553_v33, %v850_v32  ;;  %vm858_vm7 = vweird.f32 %v1553_v33 }
 0x24b   : > { %vm859_vm9 = vmor %vm857_vm8, %vm858_vm7 }
 0x24c   : > { %v853_v35 = vmul.f32 %v1553_v33, %v852_v34 }
 0x24e   : > { %v854_v36 = vmul.f32 0.5, %v853_v35 }
 0x250   : > { %v855_v37 = vsub.f32 1.5, %v854_v36 }
 0x252   : > { %v856_v39 = vmul.f32 %v1553_v33, %v855_v37 }
 0x254   : > { %v860_v41 = vsel %vm859_vm9, %v1553_v33, %v856_v39  ;;  %v946_v47 = vpop.f32.mrf.mxu1 }
 0x255   : > { %v861_v42 = vmul.f32 %v860_v41, %v780_v7 }
 0x257   : > { %v865_v43 = vmul.f32 %v1547_v40, %v861_v42 }
 0x259   : > { %1475 = vmatmul.msk.f32.vlgmr.msrb.gmra.mxu0 %vm647_vm1, %v865_v43 }
 0x25a   : > { %1482 = vmatpush.xpose.msk.msrb.mxu0 %vm922_vm6, %v1964_v19 }
 0x261   : > { %1476 = vmatmul.msk.f32.vlgmr.msra.gmra.mxu0 %vm647_vm1, %v865_v43 }
 0x2d6   : > { %v2004_v38 = vpop.f32.mrf.mxu0 }
 0x2d7   : > { %1037 = vrot.lane.b32.xlu1 %v2004_v38, %s2210_s24  ;;  %1479 = vmatpush.xpose.msk.msrb.mxu1 %vm922_vm6, %v2004_v38 }
 0x2da   : > { %1480 = vmatmul.msk.f32.vlgmr.msrb.gmra.mxu1 %vm922_vm6, %v1943_v4 }
 0x2de   : > { %v2012_v44 = vpop.f32.mrf.mxu0 }
 0x2df   : > { %1076 = vrot.lane.b32.xlu0 %v2012_v44, %s1636_s26  ;;  %1006 = vmatpush.msrb.mxu3 %v2012_v44 }
 0x2e0   : > { %1011 = vrot.lane.b32.xlu1 %v1968_v21, %s2210_s24  ;;  %s589_s24 = sand.u32 1, %s1624_s25  }
 0x2e1   : > { %1487 = vmatpush.xpose.msk.msra.mxu3 %vm922_vm6, %v1964_v19  ;;  %s1336_s21 = scalar_lea.sflag [#allocation3], %s589_s24 }
 0x2e7   : > { %1218 = vrot.lane.b32.xlu0 %v2004_v38, %s1637_s17 }
 0x349   : > { %v1038_v45 = vpop.permute.xlu1 %1037 }
 0x34a   : > { %1484 = vmatpush.xpose.msk.msra.mxu1 %vm922_vm6, %v1038_v45 }
 0x34d   : > { %1485 = vmatmul.msk.f32.vlgmr.msra.gmra.mxu1 %vm922_vm6, %v1036_v46 }
 0x351   : > { %v1077_v49 = vpop.permute.xlu0 %1076 }
 0x352   : > { %v1012_v50 = vpop.permute.xlu1 %1011  ;;  %1097 = vmatpush.msrb.mxu2 %v1077_v49 }
 0x353   : > { %1483 = vmatmul.msk.f32.vlgmr.msrb.gmra.mxu0 %vm922_vm6, %v1012_v50 }
 0x354   : > { %1492 = vmatpush.xpose.msk.msra.mxu2 %vm922_vm6, %v1964_v19 }
 0x357   : > { %v972_v53 = vpop.f32.mrf.mxu1 }
 0x358   : > { %v973_v54 = vadd.f32 %v972_v53, %v946_v47  ;;  %v1310_v53 = vld [vmem:[%s2177_s12 + $0x60] sm:$0xff] }
 0x359   : > { %v1219_v3 = vpop.permute.xlu0 %1218 }
 0x35a   : > { %v975_v55 = vsel %vm921_vm10, %v973_v54, -3.4028235e+38  ;;  %v1309_v54 = vld [vmem:[%s2177_s12 + $0x58] sm:$0xff] }
 0x35b   : > { %v977_v56 = vsel %vm976_vm11, %v975_v55, -inf }
 0x35c   : > { %978 = vmax.xlane.f32.xlu2 %v977_v56  ;;  %v1307_v56 = vld [vmem:[%s2177_s12 + $0x48] sm:$0xff] }
 0x374   : > { %1102 = vrot.lane.b32.xlu2 %v1968_v21, %s1636_s26 }
 0x37c   : > { %1126 = vrot.lane.b32.xlu2 %v1943_v4, %s1636_s26 }
 0x3ca   : > { %v1060_v58 = vpop.f32.mrf.mxu1 }
 0x3cf   : > { %v979_v57 = vpop.xlane.xlu2 %978 }
 0x3d0   : > { %v1032_v59 = vpop.f32.mrf.mxu0  ;;  %v980_v60 = vsub.f32 %v975_v55, %v979_v57  ;;  %v1308_v55 = vld [vmem:[%s2177_s12 + $0x50] sm:$0xff]  ;;  %v1306_v57 = vld [vmem:[%s2177_s12 + $0x40] sm:$0xff] }
 0x3d1   : > { %v1061_v61 = vadd.f32 %v1060_v58, %v1032_v59  ;;  %v1305_v58 = vld [vmem:[%s2177_s12 + $0x38] sm:$0xff] }
 0x3d2   : > { %v981_v62 = vmul.f32 1.442695, %v980_v60  ;;  %v1304_v60 = vld [vmem:[%s2177_s12 + $0x30] sm:$0xff] }
 0x3d3   : > { %v1063_v63 = vsel %vm921_vm10, %v1061_v61, -3.4028235e+38  ;;  %v1303_v61 = vld [vmem:[%s2177_s12 + $0x28] sm:$0xff] }
 0x3d4   : > { %1554 = vpow2.f32 %v981_v62  ;;  %v1064_v0 = vsel %vm976_vm11, %v1063_v63, -inf }
 0x3d5   : > { %1065 = vmax.xlane.f32.xlu0 %v1064_v0  ;;  %v1301_v0 = vld [vmem:[%s2177_s12 + $0x18] sm:$0xff] }
 0x3da   : > { %v1555_v1 = vpop.eup %1554 }
 0x3db   : > { %v983_v2 = vsel %vm976_vm11, %v1555_v1, 0.0 }
 0x3dc   : > { %984 = vadd.xlane.f32.xlu1 %v983_v2  ;;  %v1299_v2 = vld [vmem:[%s2177_s12 + $0x8] sm:$0xff] }
 0x3e9   : > { %1216 = vrot.lane.b32.xlu0 %v1943_v4, %s1637_s17  ;;  %v1103_v4 = vpop.permute.xlu2 %1102 }
 0x3f1   : > { %v1127_v19 = vpop.permute.xlu2 %1126 }
 0x3f5   : > { %1192 = vrot.lane.b32.xlu1 %v1968_v21, %s1637_s17  ;;  %s1462_s17 = sshll.u32 %s589_s24, 3 }
 0x3f6   : > { %s591_s29 = scalar_lea.vmem [#allocation2], %s1462_s17 }
 0x3f7   : > { %s1348_s20 = sshll.u32 %s591_s29, 4  ;;  %s1349_s20 = int_to_ptr.vmem [resolvable:$true] %s1348_s20 }
 0x448   : > { %v1066_v5 = vpop.xlane.xlu0 %1065 }
 0x449   : > { %v1067_v6 = vsub.f32 %v1063_v63, %v1066_v5  ;;  %v1302_v63 = vld [vmem:[%s2177_s12 + $0x20] sm:$0xff] }
 0x44b   : > { %v1068_v7 = vmul.f32 1.442695, %v1067_v6 }
 0x44d   : > { %1556 = vpow2.f32 %v1068_v7 }
 0x44f   : > { %v985_v9 = vpop.xlane.xlu1 %984 }
 0x450   : > { %1558 = vrcp.f32 %v985_v9 }
 0x453   : > { %v1557_v10 = vpop.eup %1556 }
 0x454   : > { %v1070_v8 = vsel %vm976_vm11, %v1557_v10, 0.0 }
 0x455   : > { %1071 = vadd.xlane.f32.xlu0 %v1070_v8 }
 0x456   : > { %v1559_v11 = vpop.eup %1558 }
 0x457   : > { %v987_v12 = vmul.f32 %v1559_v11, %v1555_v1  ;;  %v1300_v1 = vld [vmem:[%s2177_s12 + $0x10] sm:$0xff] }
 0x459   : > { %1481 = vmatmul.msk.f32.vlgmr.msrb.gmra.mxu3 %vm976_vm11, %v987_v12 }
 0x45a   : > { %1494 = vmatpush.xpose.msk.msrb.mxu3 %vm922_vm6, %v1219_v3  ;;  %v1298_v3 = vld [vmem:[%s2177_s12] sm:$0xff] }
 0x45b   : > { %v1217_v13 = vpop.permute.xlu0 %1216 }
 0x461   : > { %1488 = vmatmul.msk.f32.vlgmr.msra.gmra.mxu3 %vm922_vm6, %v1103_v4 }
 0x467   : > { %v1193_v17 = vpop.permute.xlu1 %1192 }
 0x469   : > { %1128 = vrot.lane.b32.xlu0 %v2004_v38, %s1636_s26  ;;  %1495 = vmatmul.msk.f32.vlgmr.msrb.gmra.mxu3 %vm922_vm6, %v1217_v13 }
 0x4c8   : > { %v1072_v14 = vpop.xlane.xlu0 %1071 }
 0x4c9   : > { %1560 = vrcp.f32 %v1072_v14 }
 0x4cf   : > { %v1561_v15 = vpop.eup %1560 }
 0x4d0   : > { %v1074_v16 = vmul.f32 %v1561_v15, %v1557_v10 }
 0x4d2   : > { %1486 = vmatmul.msk.f32.vlgmr.msrb.gmra.mxu2 %vm976_vm11, %v1074_v16 }
 0x4da   : > { %1493 = vmatmul.msk.f32.vlgmr.msra.gmra.mxu2 %vm922_vm6, %v1193_v17 }
 0x4db   : > { %v1129_v18 = vpop.permute.xlu0 %1128 }
 0x4dc   : > { %1489 = vmatpush.xpose.msk.msra.mxu0 %vm922_vm6, %v1129_v18  ;;  %v2062_v20 = vpop.f32.mrf.mxu3 }
 0x4df   : > { %1490 = vmatmul.msk.f32.vlgmr.msra.gmra.mxu0 %vm922_vm6, %v1127_v19 }
 0x4e4   : > { %v1123_v21 = vpop.f32.mrf.mxu3 }
 0x4ec   : > { %v1241_v24 = vpop.f32.mrf.mxu3 }
 0x555   : > { %v1099_v22 = vpop.f32.mrf.mxu2 }
 0x55c   : > { %v1151_v23 = vpop.f32.mrf.mxu0 }
 0x55d   : > { %v1152_v25 = vadd.f32 %v1151_v23, %v1123_v21  ;;  %v1213_v26 = vpop.f32.mrf.mxu2 }
 0x55e   : > { %v1242_v27 = vadd.f32 %v1241_v24, %v1213_v26 }
 0x55f   : > { %v1154_v28 = vsel %vm921_vm10, %v1152_v25, -3.4028235e+38 }
 0x560   : > { %v1155_v29 = vsel %vm976_vm11, %v1154_v28, -inf  ;;  %v1244_v30 = vsel %vm921_vm10, %v1242_v27, -3.4028235e+38 }
 0x561   : > { %1156 = vmax.xlane.f32.xlu0 %v1155_v29  ;;  %v1245_v31 = vsel %vm976_vm11, %v1244_v30, -inf }
 0x562   : > { %1246 = vmax.xlane.f32.xlu2 %v1245_v31 }
 0x57a   : > { %1166 = vrot.lane.b32.xlu2 %v2012_v44, %s1638_s27 }
 0x5d4   : > { %v1157_v32 = vpop.xlane.xlu0 %1156 }
 0x5d5   : > { %v1158_v33 = vsub.f32 %v1154_v28, %v1157_v32  ;;  %v1247_v34 = vpop.xlane.xlu2 %1246 }
 0x5d6   : > { %v1248_v35 = vsub.f32 %v1244_v30, %v1247_v34 }
 0x5d7   : > { %v1159_v36 = vmul.f32 1.442695, %v1158_v33 }
 0x5d8   : > { %v1249_v37 = vmul.f32 1.442695, %v1248_v35 }
 0x5d9   : > { %1562 = vpow2.f32 %v1159_v36 }
 0x5da   : > { %1564 = vpow2.f32 %v1249_v37 }
 0x5dd   : > { %v1167_v39 = vpop.permute.xlu2 %1166 }
 0x5de   : > { %1187 = vmatpush.msrb.mxu1 %v1167_v39 }
 0x5df   : > { %v1563_v40 = vpop.eup %1562 }
 0x5e0   : > { %v1565_v41 = vpop.eup %1564  ;;  %v1161_v42 = vsel %vm976_vm11, %v1563_v40, 0.0  ;;  %1314 = vmatpush.msra.mxu1 %v1313_v51 }
 0x5e1   : > { %1162 = vadd.xlane.f32.xlu1 %v1161_v42  ;;  %v1251_v43 = vsel %vm976_vm11, %v1565_v41, 0.0 }
 0x5e2   : > { %1252 = vadd.xlane.f32.xlu0 %v1251_v43 }
 0x5f6   : > { %1283 = vrot.lane.b32.xlu0 %v1099_v22, %s1639_s30 }
 0x5fa   : > { %1256 = vrot.lane.b32.xlu1 %v2012_v44, %s1639_s30  ;;  %v1312_v44 = vld [vmem:[%s2177_s12 + $0x70] sm:$0xff]  ;;  %s1498_s30 = sshll.u32 %s1751_s28, 3 }
 0x5fb   : > { %1315 = vmatpush.msra.mxu1 %v1312_v44 }
 0x5fd   : > { %1316 = vmatpush.msra.mxu1 %v1311_v52 }
 0x5ff   : > { %1317 = vmatpush.msra.mxu1 %v1310_v53 }
 0x601   : > { %1318 = vmatpush.msra.mxu1 %v1309_v54 }
 0x603   : > { %1319 = vmatpush.msra.mxu1 %v1308_v55 }
 0x605   : > { %1320 = vmatpush.msra.mxu1 %v1307_v56 }
 0x607   : > { %1321 = vmatpush.msra.mxu1 %v1306_v57 }
 0x609   : > { %1322 = vmatpush.msra.mxu1 %v1305_v58 }
 0x60b   : > { %1323 = vmatpush.msra.mxu1 %v1304_v60 }
 0x60d   : > { %1324 = vmatpush.msra.mxu1 %v1303_v61 }
 0x60f   : > { %1325 = vmatpush.msra.mxu1 %v1302_v63 }
 0x611   : > { %1326 = vmatpush.msra.mxu1 %v1301_v0 }
 0x613   : > { %1327 = vmatpush.msra.mxu1 %v1300_v1 }
 0x615   : > { %1328 = vmatpush.msra.mxu1 %v1299_v2 }
 0x617   : > { %1329 = vmatpush.msra.mxu1 %v1298_v3 }
 0x654   : > { %v1163_v38 = vpop.xlane.xlu1 %1162 }
 0x655   : > { %1566 = vrcp.f32 %v1163_v38  ;;  %v1253_v47 = vpop.xlane.xlu0 %1252 }
 0x656   : > { %1568 = vrcp.f32 %v1253_v47 }
 0x65b   : > { %v1567_v45 = vpop.eup %1566 }
 0x65c   : > { %v1165_v46 = vmul.f32 %v1567_v45, %v1563_v40  ;;  %v1569_v48 = vpop.eup %1568 }
 0x65d   : > { %v1255_v49 = vmul.f32 %v1569_v48, %v1565_v41 }
 0x65e   : > { %1491 = vmatmul.msk.f32.vlgmr.msrb.gmra.mxu1 %vm976_vm11, %v1165_v46 }
 0x668   : > { %v1284_v5 = vpop.permute.xlu0 %1283 }
 0x669   : > { %v1294_v6 = vsel %vm647_vm1, %v2062_v20, %v1284_v5 }
 0x66c   : > { %v1257_v50 = vpop.permute.xlu1 %1256 }
 0x66d   : > { %1277 = vmatpush.msrb.mxu0 %v1257_v50 }
 0x66e   : > { %1496 = vmatmul.msk.f32.vlgmr.msrb.gmra.mxu0 %vm976_vm11, %v1255_v49 }
 0x6db   : > { %v1189_v59 = vpop.f32.mrf.mxu1 }
 0x6dc   : > { %1287 = vrot.lane.b32.xlu0 %v1189_v59, %s1638_s27  ;;  %s1346_s27 = scalar_lea.hbm %s2211_s0, %s1498_s30  ;;  %s1590_s30 = scalar_lea.hbm %s2211_s0, 16 }
 0x6dd   : > { %s1350_s2 = sshll.u32 %s1346_s27, 4  ;;  %s1351_s2 = int_to_ptr.hbm [resolvable:$true] %s1350_s2 }
 0x6eb   : > { %v1279_v62 = vpop.f32.mrf.mxu0 }
 0x6ec   : > { %1291 = vrot.lane.b32.xlu2 %v1279_v62, %s1636_s26  ;;  %s1584_s26 = sshra.s32 %s1351_s2, 4  ;;  %s1585_s26 = int_to_ptr.hbm [resolvable:$true] %s1584_s26 }
 0x6ed   : > { %s1586_s22 = scalar_lea.hbm %s1585_s26, 8  ;;  %p1591_p0 = scmp.lt.s32.totalorder %s1585_s26, %s2211_s0 }
 0x6ee   : > { %p1587_p11 = scmp.ne.s32.totalorder %s1585_s26, %s1586_s22  ;;  %p1592_p1 = scmp.lt.s32.totalorder %s1590_s30, %s1586_s22 }
 0x6f0   : > { %p1588_p12 = pnand %p1587_p11, %p1768_p5  ;;  %p1593_p2 = por %p1592_p1, %p1591_p0 }
 0x6f2   : > { %p1589_p13 = pneg %p1588_p12 }
 0x6f4   : > { %p1594_p3 = pnand %p1593_p2, %p1589_p13 }
 0x746   : > { %v1292_v9 = vpop.permute.xlu2 %1291 }
 0x74e   : > { %v1288_v7 = vpop.permute.xlu0 %1287 }
 0x74f   : > { %v1295_v10 = vsel %vm621_vm0, %v1294_v6, %v1288_v7 }
 0x750   : > { %v1297_v8 = vsel %vm1296_vm12, %v1295_v10, %v1292_v9 }
 0x751   : > { %1330 = vmatmul.f32.vlgmr.msra.gmra.mxu1 %v1297_v8 }
 0x7ce   : > { %v1331_v11 = vpop.f32.mrf.mxu1 }
 0x7cf   : > { %1334 = vst.msk [vmem:[%s591_s29] sm:$0xff] %vm621_vm0, %v1331_v11 }
 0x7d0   : > { %1597 = shalt.err (!%p1594_p3)
}
 0x7d1   : > { %1501 = dma.vmem_to_hbm [thread:$0]  (%p1768_p5), %s1349_s20, 128, %s1351_s2, %s1336_s21  }
 0x7d2 PF: > { %s2212_s24 = sld [smem:[#allocation7_spill]] }
 0x7d3   : > { %s2213_s18 = sld [smem:[#allocation5_spill]] }
 0x7d8   : > { %p1507_p4 = scmp.ge.s32.totalorder %s2212_s24, 2 }
 0x7d9   : > { %s1362_s29 = sand.u32 1, %s2213_s18  }
 0x7da   : > { %p1504_p7 = pnand %p1507_p4, %p1772_p6  ;;  %s1363_s3 = scalar_lea.sflag [#allocation3], %s1362_s29 }
 0x7dc   : > { %p1505_p8 = pneg %p1504_p7 }
 0x7de   : > { %1615 = dma.done.wait (%p1505_p8), %s1363_s3, 128  }
 0x7df   : > { %1617 = vsyncadd (%p1505_p8), %s1363_s3, 4294967168  ;;  %s2215_s27 = sld [smem:[#allocation8_spill]]  ;;  %s2218_s24 = smov %s1624_s25 }
 0x7e0   : > { %s2216_s26 = sld [smem:[#allocation6_spill]] }
 0x7e1   : > { %s2217_s22 = sld [smem:[#allocation9_spill]] }
 0x7e5   : > { %p27_p9 = scmp.ge.s32.totalorder %s2215_s27, 4  }
 0x7e6   : > { %s2219_s25 = smov %s2216_s26 }
 0x7e7   : > { %s2220_s26 = smov %s2217_s22  ;;  %29 = sbr.rel (!%p27_p9) target bundleno = 9 (0x9), region = 135 }
 0x7ec   :  { %1369 = vsyncpa [#allocation3], 1 }
 0x7ed   :  { %1371 = vsyncpa [#allocation3 + $0x1], 1 }

</bundles_post_ra>
